<compile_context>
chip_gen: v7x
topology: tpu7x:2x2x1
jax: 0.10.0
libtpu: 0.0.40
codegen_flags: <defaults>
</compile_context>

<pallas_src>
import jax
import jax.numpy as jnp
from jax.experimental import pallas as pl
from jax.experimental.pallas import tpu as pltpu


def _round_up(x, m):
    return ((x + m - 1) // m) * m


def mlp_kernel(x_ref, w1_ref, b1_ref, w2_ref, b2_ref, o_ref):
    # Linear 1 on the MXU: bf16 x bf16 -> f32 accumulate.
    x = x_ref[...].astype(jnp.bfloat16)          # no-op when x arrives as bf16
    h = jnp.dot(x, w1_ref[...], preferred_element_type=jnp.float32)
    # Bias + ReLU in f32 on the VPU.
    h = jnp.maximum(h + b1_ref[...], 0.0)
    # Linear 2 on the MXU (lane-dense 128-wide padded output), bias in f32.
    o = jnp.dot(h.astype(jnp.bfloat16), w2_ref[...],
                preferred_element_type=jnp.float32)
    o_ref[...] = (o + b2_ref[...]).astype(o_ref.dtype)


def mlp_forward(x, w1, b1, w2, b2, *, block_b=512, out_dtype=jnp.float32):
    """x: [B, D_in] (f32 or bf16); w1: [D_in, H]; b1: [1, H]; w2: [H, D_out]; b2: [1, D_out]."""
    B, D_in = x.shape
    H = w1.shape[1]
    D_out = w2.shape[1]

    # --- lane-dense output: pad D_out up to a multiple of 128 with zeros ---
    D_out_pad = max(128, _round_up(D_out, 128))
    if D_out_pad != D_out:
        w2 = jnp.pad(w2, ((0, 0), (0, D_out_pad - D_out)))
        b2 = jnp.pad(b2, ((0, 0), (0, D_out_pad - D_out)))

    # --- bf16 weight storage (halves weight DMA); biases stay f32 ---
    w1 = w1.astype(jnp.bfloat16)
    w2 = w2.astype(jnp.bfloat16)
    b1 = b1.astype(jnp.float32)
    b2 = b2.astype(jnp.float32)

    # --- adaptive batch tiling: minimize pad rows, keep >=2 (even) grid steps
    #     when B is large enough so both v7x TensorCores are used ------------
    n_steps = max(1, pl.cdiv(B, block_b))
    if n_steps == 1 and B >= 16:
        n_steps = 2
    if n_steps > 1 and n_steps % 2 == 1:
        n_steps += 1
    TB = _round_up(pl.cdiv(B, n_steps), 8)
    B_pad = _round_up(B, TB)
    if B_pad != B:
        x = jnp.pad(x, ((0, B_pad - B), (0, 0)))
    # NOTE: no x dtype cast here -- a standalone astype would just add an HBM
    # round trip; the kernel consumes x in whatever dtype the caller provides.

    grid = (B_pad // TB,)

    x_bytes = jnp.dtype(x.dtype).itemsize
    o_bytes = jnp.dtype(out_dtype).itemsize
    flops = 2 * B_pad * (D_in * H + H * D_out_pad)
    bytes_accessed = (B_pad * D_in * x_bytes        # x
                      + D_in * H * 2                # w1 (bf16)
                      + H * D_out_pad * 2           # w2 (bf16)
                      + H * 4 + D_out_pad * 4       # biases (f32)
                      + B_pad * D_out_pad * o_bytes)  # out

    out = pl.pallas_call(
        mlp_kernel,
        out_shape=jax.ShapeDtypeStruct((B_pad, D_out_pad), out_dtype),
        grid=grid,
        in_specs=[
            pl.BlockSpec((TB, D_in), lambda i: (i, 0)),       # x tile moves
            pl.BlockSpec((D_in, H), lambda i: (0, 0)),        # weights resident
            pl.BlockSpec((1, H), lambda i: (0, 0)),
            pl.BlockSpec((H, D_out_pad), lambda i: (0, 0)),
            pl.BlockSpec((1, D_out_pad), lambda i: (0, 0)),
        ],
        out_specs=pl.BlockSpec((TB, D_out_pad), lambda i: (i, 0)),
        compiler_params=pltpu.CompilerParams(
            dimension_semantics=("parallel",),
            vmem_limit_bytes=32 * 1024 * 1024,
        ),
        cost_estimate=pl.CostEstimate(
            flops=flops, transcendentals=0, bytes_accessed=bytes_accessed),
    )(x, w1, b1, w2, b2)

    return out[:B, :D_out]


def init_params(key, d_in=256, d_hidden=1024, d_out=52):
    """Deterministic synthetic parameter init (PyTorch-Linear-style uniform ranges)."""
    k1, k2, k3, k4 = jax.random.split(key, 4)
    bound1 = 1.0 / (d_in ** 0.5)
    bound2 = 1.0 / (d_hidden ** 0.5)
    w1 = jax.random.uniform(k1, (d_in, d_hidden), jnp.float32, -bound1, bound1)
    b1 = jax.random.uniform(k2, (1, d_hidden), jnp.float32, -bound1, bound1)
    w2 = jax.random.uniform(k3, (d_hidden, d_out), jnp.float32, -bound2, bound2)
    b2 = jax.random.uniform(k4, (1, d_out), jnp.float32, -bound2, bound2)
    return w1, b1, w2, b2


if __name__ == "__main__":
    D_IN, D_HIDDEN, D_OUT = 256, 1024, 52
    B = 384  # with adaptive tiling: TB=192, 2 grid steps, zero pad rows

    key = jax.random.PRNGKey(0)
    kx, kp = jax.random.split(key)
    x_f32 = jax.random.normal(kx, (B, D_IN), dtype=jnp.float32)
    # bf16 at the API boundary (halves the activation DMA on v6e/v7x).
    x = x_f32.astype(jnp.bfloat16)
    w1, b1, w2, b2 = init_params(kp, D_IN, D_HIDDEN, D_OUT)

    out = mlp_forward(x, w1, b1, w2, b2)
    out = jax.block_until_ready(out)

    # Pure-JAX f32 reference (kernel uses bf16 x / weights / h -> loose tolerance).
    ref = jnp.maximum(x_f32 @ w1 + b1, 0.0) @ w2 + b2
    assert out.shape == (B, D_OUT)
    assert jnp.allclose(out, ref, atol=3e-2, rtol=3e-2), \
        float(jnp.max(jnp.abs(out - ref)))

    print("KERNEL_OK")
</pallas_src>

<mosaic_0001>
module attributes {stable_mosaic.version = 11 : i64} {
  func.func @mlp_kernel(%arg0: i32, %arg1: memref<192x256xbf16, #tpu.memory_space<vmem>>, %arg2: memref<256x1024xbf16, #tpu.memory_space<vmem>>, %arg3: memref<1x1024xf32, #tpu.memory_space<vmem>>, %arg4: memref<1024x128xbf16, #tpu.memory_space<vmem>>, %arg5: memref<1x128xf32, #tpu.memory_space<vmem>>, %arg6: memref<192x128xf32, #tpu.memory_space<vmem>>) attributes {dimension_semantics = [#tpu.dimension_semantics<parallel>], iteration_bounds = array<i64: 2>, scalar_prefetch = 0 : i64, scratch_operands = 0 : i64, tpu.core_type = #tpu.core_type<tc>, window_params = [{transform_indices = @transform_0, window_bounds = array<i64: 192, 256>}, {pipeline_mode = #tpu.pipeline_mode<synchronous>, transform_indices = @transform_1, window_bounds = array<i64: 256, 1024>}, {pipeline_mode = #tpu.pipeline_mode<synchronous>, transform_indices = @transform_2, window_bounds = array<i64: 1, 1024>}, {pipeline_mode = #tpu.pipeline_mode<synchronous>, transform_indices = @transform_3, window_bounds = array<i64: 1024, 128>}, {pipeline_mode = #tpu.pipeline_mode<synchronous>, transform_indices = @transform_4, window_bounds = array<i64: 1, 128>}, {transform_indices = @transform_5, window_bounds = array<i64: 192, 128>}]} {
    %c0 = arith.constant 0 : index
    %c0_0 = arith.constant 0 : index
    %0 = vector.load %arg1[%c0, %c0_0] : memref<192x256xbf16, #tpu.memory_space<vmem>>, vector<192x256xbf16>
    %c0_1 = arith.constant 0 : index
    %c0_2 = arith.constant 0 : index
    %1 = vector.load %arg2[%c0_1, %c0_2] : memref<256x1024xbf16, #tpu.memory_space<vmem>>, vector<256x1024xbf16>
    %cst = arith.constant dense<0.000000e+00> : vector<192x1024xf32>
    %2 = tpu.matmul %0, %1, %cst {dimension_numbers = #tpu.dot_dimension_numbers<[1], [0], [0], [1], [0, 0, 1, 1], [], []>} : vector<192x256xbf16>, vector<256x1024xbf16>, vector<192x1024xf32> -> vector<192x1024xf32>
    %c0_3 = arith.constant 0 : index
    %c0_4 = arith.constant 0 : index
    %3 = vector.load %arg3[%c0_3, %c0_4] : memref<1x1024xf32, #tpu.memory_space<vmem>>, vector<1x1024xf32>
    %4 = vector.broadcast %3 : vector<1x1024xf32> to vector<192x1024xf32>
    %5 = arith.addf %2, %4 : vector<192x1024xf32>
    %cst_5 = arith.constant 0.000000e+00 : f32
    %6 = vector.broadcast %cst_5 : f32 to vector<192x1024xf32>
    %7 = arith.maximumf %5, %6 : vector<192x1024xf32>
    %8 = arith.truncf %7 : vector<192x1024xf32> to vector<192x1024xbf16>
    %c0_6 = arith.constant 0 : index
    %c0_7 = arith.constant 0 : index
    %9 = vector.load %arg4[%c0_6, %c0_7] : memref<1024x128xbf16, #tpu.memory_space<vmem>>, vector<1024x128xbf16>
    %cst_8 = arith.constant dense<0.000000e+00> : vector<192x128xf32>
    %10 = tpu.matmul %8, %9, %cst_8 {dimension_numbers = #tpu.dot_dimension_numbers<[1], [0], [0], [1], [0, 0, 1, 1], [], []>} : vector<192x1024xbf16>, vector<1024x128xbf16>, vector<192x128xf32> -> vector<192x128xf32>
    %c0_9 = arith.constant 0 : index
    %c0_10 = arith.constant 0 : index
    %11 = vector.load %arg5[%c0_9, %c0_10] : memref<1x128xf32, #tpu.memory_space<vmem>>, vector<1x128xf32>
    %12 = vector.broadcast %11 : vector<1x128xf32> to vector<192x128xf32>
    %13 = arith.addf %10, %12 : vector<192x128xf32>
    %c0_11 = arith.constant 0 : index
    %c0_12 = arith.constant 0 : index
    %14 = vector.load %arg6[%c0_11, %c0_12] : memref<192x128xf32, #tpu.memory_space<vmem>>, vector<192x128xf32>
    tpu.vector_store %arg6[%c0_11, %c0_12], %13 {strides = array<i32>} : memref<192x128xf32, #tpu.memory_space<vmem>>, vector<192x128xf32>,
    return
  }
  func.func @transform_0(%arg0: i32) -> (i32, i32) {
    %c0_i32 = arith.constant 0 : i32
    %c0_i32_0 = arith.constant 0 : i32
    return %arg0, %c0_i32 : i32, i32
  }
  func.func @transform_1(%arg0: i32) -> (i32, i32) {
    %c0_i32 = arith.constant 0 : i32
    %c0_i32_0 = arith.constant 0 : i32
    %c0_i32_1 = arith.constant 0 : i32
    return %c0_i32, %c0_i32_0 : i32, i32
  }
  func.func @transform_2(%arg0: i32) -> (i32, i32) {
    %c0_i32 = arith.constant 0 : i32
    %c0_i32_0 = arith.constant 0 : i32
    %c0_i32_1 = arith.constant 0 : i32
    return %c0_i32, %c0_i32_0 : i32, i32
  }
  func.func @transform_3(%arg0: i32) -> (i32, i32) {
    %c0_i32 = arith.constant 0 : i32
    %c0_i32_0 = arith.constant 0 : i32
    %c0_i32_1 = arith.constant 0 : i32
    return %c0_i32, %c0_i32_0 : i32, i32
  }
  func.func @transform_4(%arg0: i32) -> (i32, i32) {
    %c0_i32 = arith.constant 0 : i32
    %c0_i32_0 = arith.constant 0 : i32
    %c0_i32_1 = arith.constant 0 : i32
    return %c0_i32, %c0_i32_0 : i32, i32
  }
  func.func @transform_5(%arg0: i32) -> (i32, i32) {
    %c0_i32 = arith.constant 0 : i32
    %c0_i32_0 = arith.constant 0 : i32
    return %arg0, %c0_i32 : i32, i32
  }
}

</mosaic_0001>

<bundles_post_ra>
// kernel: tpu_custom_call.1
= control target key start
LH: loop header
LB: loop body
LE: loop exit
PB: predicated region body
PF: predicated region fallthrough
CT: control target
= control target key end

     0   :  { %10 = vsyncpa [#allocation3], 0  ;;  %s5111_s0 = inlined_call_operand.hbm [shape: bf16[384,256], index: 0, kind: input, shape index: {}]   ;;  %s5112_s1 = inlined_call_operand.hbm [shape: bf16[256,1024], index: 1, kind: input, shape index: {}]   ;;  %s5113_s2 = inlined_call_operand.hbm [shape: f32[1,1024], index: 2, kind: input, shape index: {}]   ;;  %s5114_s3 = inlined_call_operand.hbm [shape: bf16[1024,128], index: 3, kind: input, shape index: {}]   ;;  %s5115_s4 = inlined_call_operand.vmem [shape: f32[1,128], index: 4, kind: input, shape index: {}]   ;;  %s5116_s5 = inlined_call_operand.hbm [shape: f32[384,128], index: 5, kind: output, shape index: {}]  }
   0x1   :  { %12 = vsyncpa [#allocation3 + $0x1], 0 }
   0x2   :  { %13 = vsyncpa [#allocation6], 0 }
   0x3   :  { %14 = vsyncpa [#allocation9], 0 }
   0x4   :  { %15 = vsyncpa [#allocation4], 0 }
   0x5   :  { %17 = vsyncpa [#allocation4 + $0x1], 0  ;;  %s4327_s18 = smov 0   ;;  %s4329_s19 = smov 0  }
   0x6   :  { %s4331_s20 = smov 0   ;;  %s4333_s21 = smov 0  }
   0x7 LB: > { %s4348_s22 = sadd.s32 4294967295, %s4282_s21   ;;  %s3318_s23 = sadd.s32 4294967294, %s4282_s21   ;;  %s4282_s21 = sphi %s4333_s21, %s5139_s21   ;;  %s4278_s20 = sphi %s4331_s20, %s5138_s20   ;;  %s4274_s19 = sphi %s4329_s19, %s5137_s19   ;;  %s4270_s18 = sphi %s4327_s18, %s5136_s18  }
   0x8   : > { %p43_p0 = scmp.ne.s32.totalorder %s4274_s19, %s4270_s18  ;;  %p5117_p1 = scmp.eq.s32.totalorder %s4348_s22, 0 }
   0x9   : > { %p157_p3 = scmp.eq.s32.totalorder %s3318_s23, 1  ;;  %p3319_p5 = scmp.ge.s32.totalorder %s4282_s21, 1 }
   0xa   : > { %p4357_p4 = por %p5117_p1, %p43_p0  ;;  %p164_p7 = scmp.lt.s32.totalorder %s4282_s21, 3 }
   0xb   : > { %p4362_p6 = por %p157_p3, %p43_p0  ;;  %s4284_s27 = smov [#allocation5]  }
   0xc   : > { %s5120_s24 = scalar_select %p4357_p4, 1, 0 }
   0xd   : > { %s5121_s25 = scalar_select %p4362_p6, 1, 0 }
   0xe   : > { %p4367_p8 = pnand %p3319_p5, %p164_p7  ;;  %s176_s28 = sshll.u32 %s4284_s27, 4  ;;  %s4371_s28 = int_to_ptr.vmem [resolvable:$true] %s176_s28 }
   0xf   : > { %s4285_s30 = smov [#allocation7]   ;;  %s4286_s7 = smov [#allocation8]  }
  0x10   : > { %s5122_s26 = scalar_select %p4367_p8, 1, 0 }
  0x11   : > { %p3924_p9 = pneg %p4367_p8  ;;  %s190_s6 = sshll.u32 %s4285_s30, 4  ;;  %s4382_s6 = int_to_ptr.vmem [resolvable:$true] %s190_s6 }
  0x12   : > { %s4384_s8 = sshll.u32 %s4286_s7, 4  ;;  %s4094_s11 = scalar_lea.hbm %s5112_s1, 16384  ;;  %s201_s8 = int_to_ptr.vmem [resolvable:$true] %s4384_s8 }
  0x13   : > { %p4378_p11 = pnand %p3924_p9, %p5117_p1  ;;  %p4095_p12 = scmp.ne.s32.totalorder %s5112_s1, %s4094_s11 }
  0x14   : > { %p4101_p5 = scmp.lt.u32.totalorder %s4094_s11, %s5112_s1 }
  0x15   : > { %p4394_p13 = pneg %p4378_p11 }
  0x17   : > { %p4097_p0 = pnand %p4394_p13, %p4095_p12 }
  0x19   : > { %p4098_p3 = pneg %p4097_p0 }
  0x1b   : > { %p4103_p7 = pnand %p4101_p5, %p4098_p3 }
  0x1d   : > { %4106 = shalt.err (!%p4103_p7)
}
  0x1e   : > { %s4107_s17 = scalar_lea.vmem %s4371_s28, 16384  ;;  %p4115_p2 = scmp.lt.s32.totalorder %s4371_s28, %s4371_s28 }
  0x1f   : > { %p4108_p9 = scmp.ne.s32.totalorder %s4371_s28, %s4107_s17  ;;  %p4116_p6 = scmp.lt.s32.totalorder %s4107_s17, %s4107_s17 }
  0x21   : > { %p4110_p10 = pnand %p4108_p9, %p4394_p13  ;;  %p4117_p12 = por %p4116_p6, %p4115_p2 }
  0x23   : > { %p4111_p1 = pneg %p4110_p10 }
  0x25   : > { %p4118_p0 = pnand %p4117_p12, %p4111_p1 }
  0x27   : > { %4121 = shalt.err (!%p4118_p0)
}
  0x28   : > { %s4287_s23 = smov 512   ;;  %s4288_s27 = smov 32  }
  0x29   : > { %3927 = dma.hbm_to_vmem [thread:$0]  (!%p4378_p11), %s5112_s1, 16384, %s4371_s28, [#allocation6], %s4287_s23, %s4287_s23, %s4288_s27  }
  0x2a   : > { %s4122_s11 = scalar_lea.hbm %s5113_s2, 128 }
  0x2b   : > { %p4123_p2 = scmp.ne.s32.totalorder %s5113_s2, %s4122_s11  ;;  %p4129_p10 = scmp.lt.u32.totalorder %s4122_s11, %s5113_s2 }
  0x2d   : > { %p4125_p1 = pnand %p4123_p2, %p4394_p13 }
  0x2f   : > { %p4126_p6 = pneg %p4125_p1 }
  0x31   : > { %p4131_p3 = pnand %p4129_p10, %p4126_p6 }
  0x33   : > { %4134 = shalt.err (!%p4131_p3)
}
  0x34   : > { %s4135_s28 = scalar_lea.vmem %s4382_s6, 128  ;;  %p4143_p12 = scmp.lt.s32.totalorder %s4382_s6, %s4382_s6 }
  0x35   : > { %p4136_p5 = scmp.ne.s32.totalorder %s4382_s6, %s4135_s28  ;;  %p4144_p0 = scmp.lt.s32.totalorder %s4135_s28, %s4135_s28 }
  0x37   : > { %p4138_p7 = pnand %p4136_p5, %p4394_p13  ;;  %p4145_p2 = por %p4144_p0, %p4143_p12 }
  0x39   : > { %p4139_p9 = pneg %p4138_p7 }
  0x3b   : > { %p4146_p1 = pnand %p4145_p2, %p4139_p9 }
  0x3d   : > { %4149 = shalt.err (!%p4146_p1)
}
  0x3e   : > { %3930 = dma.hbm_to_vmem [thread:$0]  (!%p4378_p11), %s5113_s2, 128, %s4382_s6, [#allocation6]  }
  0x3f   : > { %s4150_s7 = scalar_lea.hbm %s5114_s3, 8192 }
  0x40   : > { %p4151_p6 = scmp.ne.s32.totalorder %s5114_s3, %s4150_s7  ;;  %p4157_p5 = scmp.lt.u32.totalorder %s4150_s7, %s5114_s3 }
  0x42   : > { %p4153_p10 = pnand %p4151_p6, %p4394_p13 }
  0x44   : > { %p4154_p3 = pneg %p4153_p10 }
  0x46   : > { %p4159_p7 = pnand %p4157_p5, %p4154_p3 }
  0x48   : > { %4162 = shalt.err (!%p4159_p7)
}
  0x49   : > { %s4163_s13 = scalar_lea.vmem %s201_s8, 8192  ;;  %p4171_p2 = scmp.lt.s32.totalorder %s201_s8, %s201_s8 }
  0x4a   : > { %p4164_p9 = scmp.ne.s32.totalorder %s201_s8, %s4163_s13  ;;  %p4172_p1 = scmp.lt.s32.totalorder %s4163_s13, %s4163_s13 }
  0x4c   : > { %p4166_p12 = pnand %p4164_p9, %p4394_p13  ;;  %p4173_p4 = por %p4172_p1, %p4171_p2 }
  0x4e   : > { %p4167_p0 = pneg %p4166_p12 }
  0x50   : > { %p4174_p8 = pnand %p4173_p4, %p4167_p0 }
  0x52   : > { %4177 = shalt.err (!%p4174_p8)
}
  0x53   : > { %s4289_s6 = smov 64   ;;  %s4290_s14 = smov 4  }
  0x54   : > { %3933 = dma.hbm_to_vmem [thread:$0]  (!%p4378_p11), %s5114_s3, 8192, %s201_s8, [#allocation9], %s4289_s6, %s4289_s6, %s4290_s14  }
  0x55   : > { %s4458_s28 = sadd.s32 1, %s4282_s21   ;;  %s30_s23 = sadd.s32 1, %s4278_s20 }
  0x56   : > { %s27_s17 = ssub.s32 %s4282_s21, %s4458_s28  ;;  %p37_p8 = scmp.ne.s32.totalorder %s4278_s20, %s4274_s19 }
  0x57   : > { %p28_p4 = scmp.eq.s32.totalorder %s27_s17, 0  ;;  %p38_p13 = scmp.eq.s32.totalorder %s4282_s21, 0 }
  0x58   : > { %p3945_p6 = scmp.lt.s32.totalorder %s4282_s21, 2  ;;  %p5125_p3 = scmp.eq.s32.totalorder %s4348_s22, 1 }
  0x59   : > { %s4468_s27 = scalar_select %p28_p4, %s4278_s20, %s30_s23  }
  0x5a   : > { %p39_p10 = por %p38_p13, %p37_p8  ;;  %p4472_p5 = por %p5125_p3, %p37_p8 }
  0x5b   : > { %s217_s29 = sand.u32 1, %s4278_s20   ;;  %s3553_s7 = smul.u32 3072, %s4282_s21 }
  0x5c   : > { %s3906_s8 = smul.u32 192, %s217_s29  ;;  %p4483_p11 = pnand %p3945_p6, %p39_p10 }
  0x5d   : > { %s4481_s11 = scalar_lea.hbm %s5111_s0, %s3553_s7  ;;  %s4489_s14 = scalar_lea.sflag [#allocation3], %s217_s29 }
  0x5e   : > { %s221_s13 = scalar_lea.vmem [#allocation2], %s3906_s8  ;;  %s4178_s15 = scalar_lea.hbm %s4481_s11, 3072 }
  0x5f   : > { %s229_s6 = sshll.u32 %s221_s13, 4  ;;  %p4179_p7 = scmp.ne.s32.totalorder %s4481_s11, %s4178_s15  ;;  %s4487_s6 = int_to_ptr.vmem [resolvable:$true] %s229_s6 }
  0x60   : > { %p4180_p9 = pneg %p4483_p11  ;;  %s4183_s23 = scalar_lea.hbm %s5111_s0, 6144 }
  0x61   : > { %p4184_p2 = scmp.lt.u32.totalorder %s4481_s11, %s5111_s0  ;;  %p4185_p1 = scmp.lt.u32.totalorder %s4183_s23, %s4178_s15 }
  0x62   : > { %p4181_p12 = pnand %p4180_p9, %p4179_p7  ;;  %p4187_p8 = scmp.lt.u32.totalorder %s4178_s15, %s4481_s11 }
  0x63   : > { %p4186_p4 = por %p4185_p1, %p4184_p2 }
  0x64   : > { %p4182_p0 = pneg %p4181_p12 }
  0x65   : > { %p4188_p13 = por %p4187_p8, %p4186_p4 }
  0x67   : > { %p4189_p6 = pnand %p4188_p13, %p4182_p0 }
  0x69   : > { %4192 = shalt.err (!%p4189_p6)
}
  0x6a   : > { %s4193_s29 = scalar_lea.vmem %s4487_s6, 3072  ;;  %s4291_s8 = smov [#allocation2]  }
  0x6b   : > { %p4194_p10 = scmp.ne.s32.totalorder %s4487_s6, %s4193_s29  ;;  %s4198_s10 = sshll.u32 %s4291_s8, 4  ;;  %s4199_s10 = int_to_ptr.vmem [resolvable:$false] %s4198_s10 }
  0x6c   : > { %s4200_s13 = scalar_lea.vmem %s4199_s10, 6144  ;;  %p4201_p12 = scmp.lt.s32.totalorder %s4487_s6, %s4199_s10 }
  0x6d   : > { %p4196_p3 = pnand %p4194_p10, %p4180_p9  ;;  %p4202_p2 = scmp.lt.s32.totalorder %s4200_s13, %s4193_s29 }
  0x6f   : > { %p4197_p7 = pneg %p4196_p3  ;;  %p4203_p1 = por %p4202_p2, %p4201_p12 }
  0x71   : > { %p4204_p4 = pnand %p4203_p1, %p4197_p7 }
  0x73   : > { %4207 = shalt.err (!%p4204_p4)
}
  0x74   : > { %s4292_s15 = smov 128   ;;  %s4293_s16 = smov 8  }
  0x75   : > { %3937 = dma.hbm_to_vmem [thread:$0]  (!%p4483_p11), %s4481_s11, 3072, %s4487_s6, %s4489_s14, %s4292_s15, %s4292_s15, %s4293_s16  }
  0x76   : > { %p5128_p9 = scmp.ne.s32.totalorder %s5122_s26, 0 }
  0x77   : > { %s4520_s17 = sand.u32 (!%p5128_p9), 1, %s4274_s19   ;;  %p5129_p0 = scmp.ne.s32.totalorder (!%p5128_p9), %s5120_s24, 0 }
  0x78   : > { %241 = sbr.rel (%p5128_p9) target bundleno = 845 (0x34d), region = 40  ;;  %s244_s7 = scalar_lea.sflag (!%p5128_p9), [#allocation3], %s4520_s17 }
  0x79   : > { %s3907_s23 = smul.u32 (!%p5128_p9), 192, %s4520_s17 }
  0x7b   : > { %s4526_s9 = scalar_lea.vmem (!%p5128_p9), [#allocation2], %s3907_s23 }
  0x7f   : > { %4253 = dma.done.wait (%p5129_p0), %s244_s7, 3072  }
  0x80   : > { %4255 = vsyncadd (%p5129_p0), %s244_s7, 4294964224  ;;  %p5130_p11 = scmp.eq.s32.totalorder %s4348_s22, 0 }
  0x82   : > { %4257 = dma.done.wait (%p5130_p11), [#allocation6], 16512   ;;  %p5131_p8 = pmov %p5130_p11 }
  0x84   : > { %4259 = vsyncadd (%p5131_p8), [#allocation6], 4294950784  ;;  %p5132_p13 = pmov %p5131_p8 }
  0x85   : > { %p5133_p6 = pmov %p5131_p8 }
  0x86   : > { %4261 = dma.done.wait (%p5132_p13), [#allocation9], 8192  }
  0x87   : > { %4263 = vsyncadd (%p5133_p6), [#allocation9], 4294959104  ;;  %v313_v0 = vld [vmem:[#allocation5] sm:$0xff]  ;;  %v314_v2 = vld [vmem:[#allocation5 + $0x8] sm:$0xff]  ;;  %s5012_s11 = scalar_lea.vmem [#allocation10], %s3907_s23  ;;  %s3552_s12 = smul.u32 3072, %s4348_s22 }
  0x88   : > { %v317_v1 = vld [vmem:[#allocation5 + $0x20] sm:$0xff]  ;;  %v318_v4 = vld [vmem:[#allocation5 + $0x28] sm:$0xff]  ;;  %s3216_s6 = sshll.u32 %s5012_s11, 4  ;;  %s3203_s22 = scalar_lea.sflag [#allocation4], %s4520_s17  ;;  %s5065_s6 = int_to_ptr.vmem [resolvable:$true] %s3216_s6 }
  0x89   : > { %v3355_v3 = vcombine.high %v313_v0, %v317_v1  ;;  %v3354_v5 = vcombine.low %v313_v0, %v317_v1  ;;  %v321_v6 = vld [vmem:[#allocation5 + $0x40] sm:$0xff]  ;;  %v3357_v8 = vcombine.high %v314_v2, %v318_v4  ;;  %v3356_v9 = vcombine.low %v314_v2, %v318_v4  ;;  %v322_v11 = vld [vmem:[#allocation5 + $0x48] sm:$0xff]  ;;  %s5063_s8 = scalar_lea.hbm %s5116_s5, %s3552_s12  ;;  %s4208_s10 = scalar_lea.vmem %s5065_s6, 3072 }
  0x8a   : > { %v325_v7 = vld [vmem:[#allocation5 + $0x60] sm:$0xff]  ;;  %v326_v12 = vld [vmem:[#allocation5 + $0x68] sm:$0xff]  ;;  %p4209_p10 = scmp.ne.s32.totalorder %s5065_s6, %s4208_s10  ;;  %s4294_s13 = smov [#allocation10]  }
  0x8b   : > { %v3363_v10 = vcombine.high %v321_v6, %v325_v7  ;;  %v329_v13 = vld [vmem:[#allocation5 + $0x80] sm:$0xff]  ;;  %1243 = vmatprep.subr.bf16.mxu0 %v3355_v3  ;;  %v3365_v14 = vcombine.high %v322_v11, %v326_v12  ;;  %v330_v16 = vld [vmem:[#allocation5 + $0x88] sm:$0xff]  ;;  %1396 = vmatprep.subr.bf16.mxu1 %v3357_v8  ;;  %v3362_v18 = vcombine.low %v321_v6, %v325_v7  ;;  %s4212_s15 = sshll.u32 %s4294_s13, 4  ;;  %s4213_s15 = int_to_ptr.vmem [resolvable:$false] %s4212_s15 }
  0x8c   : > { %v333_v15 = vld [vmem:[#allocation5 + $0xa0] sm:$0xff]  ;;  %v334_v17 = vld [vmem:[#allocation5 + $0xa8] sm:$0xff]  ;;  %1244 = vmatpush1.bf16.msra.mxu0 %v3354_v5  ;;  %1397 = vmatpush1.bf16.msra.mxu1 %v3356_v9  ;;  %v3364_v19 = vcombine.low %v322_v11, %v326_v12  ;;  %p4210_p3 = pnand %p4209_p10, %p4472_p5  ;;  %s4214_s16 = scalar_lea.vmem %s4213_s15, 6144 }
  0x8d   : > { %1245 = vmatprep.subr.bf16.mxu0 %v3363_v10  ;;  %v3371_v20 = vcombine.high %v329_v13, %v333_v15  ;;  %1398 = vmatprep.subr.bf16.mxu1 %v3365_v14  ;;  %v3373_v21 = vcombine.high %v330_v16, %v334_v17  ;;  %v337_v22 = vld [vmem:[#allocation5 + $0xc0] sm:$0xff]  ;;  %v338_v24 = vld [vmem:[#allocation5 + $0xc8] sm:$0xff]  ;;  %v3370_v26 = vcombine.low %v329_v13, %v333_v15  ;;  %p4215_p12 = scmp.lt.s32.totalorder %s5065_s6, %s4213_s15  ;;  %p4216_p2 = scmp.lt.s32.totalorder %s4214_s16, %s4208_s10 }
  0x8e   : > { %v341_v23 = vld [vmem:[#allocation5 + $0xe0] sm:$0xff]  ;;  %v342_v25 = vld [vmem:[#allocation5 + $0xe8] sm:$0xff]  ;;  %v3372_v27 = vcombine.low %v330_v16, %v334_v17  ;;  %p4211_p7 = pneg %p4210_p3 }
  0x8f   : > { %v3379_v28 = vcombine.high %v337_v22, %v341_v23  ;;  %v3381_v29 = vcombine.high %v338_v24, %v342_v25  ;;  %v345_v30 = vld [vmem:[#allocation5 + $0x100] sm:$0xff]  ;;  %v346_v32 = vld [vmem:[#allocation5 + $0x108] sm:$0xff]  ;;  %v3378_v34 = vcombine.low %v337_v22, %v341_v23  ;;  %v3380_v35 = vcombine.low %v338_v24, %v342_v25  ;;  %p4217_p1 = por %p4216_p2, %p4215_p12 }
  0x90   : > { %1246 = vmatpush1.bf16.msra.mxu0 %v3362_v18  ;;  %1399 = vmatpush1.bf16.msra.mxu1 %v3364_v19  ;;  %v349_v31 = vld [vmem:[#allocation5 + $0x120] sm:$0xff]  ;;  %v350_v33 = vld [vmem:[#allocation5 + $0x128] sm:$0xff] }
  0x91   : > { %1247 = vmatprep.subr.bf16.mxu0 %v3371_v20  ;;  %1400 = vmatprep.subr.bf16.mxu1 %v3373_v21  ;;  %v3387_v36 = vcombine.high %v345_v30, %v349_v31  ;;  %v3389_v37 = vcombine.high %v346_v32, %v350_v33  ;;  %v353_v38 = vld [vmem:[#allocation5 + $0x140] sm:$0xff]  ;;  %v354_v40 = vld [vmem:[#allocation5 + $0x148] sm:$0xff]  ;;  %v3386_v42 = vcombine.low %v345_v30, %v349_v31  ;;  %p4218_p4 = pnand %p4217_p1, %p4211_p7 }
  0x92   : > { %v357_v39 = vld [vmem:[#allocation5 + $0x160] sm:$0xff]  ;;  %v358_v41 = vld [vmem:[#allocation5 + $0x168] sm:$0xff]  ;;  %v3388_v43 = vcombine.low %v346_v32, %v350_v33 }
  0x93   : > { %v3395_v44 = vcombine.high %v353_v38, %v357_v39  ;;  %v3397_v45 = vcombine.high %v354_v40, %v358_v41  ;;  %v361_v46 = vld [vmem:[#allocation5 + $0x180] sm:$0xff]  ;;  %v362_v48 = vld [vmem:[#allocation5 + $0x188] sm:$0xff]  ;;  %v3394_v50 = vcombine.low %v353_v38, %v357_v39  ;;  %v3396_v51 = vcombine.low %v354_v40, %v358_v41 }
  0x94   : > { %1248 = vmatpush1.bf16.msra.mxu0 %v3370_v26  ;;  %1401 = vmatpush1.bf16.msra.mxu1 %v3372_v27  ;;  %v365_v47 = vld [vmem:[#allocation5 + $0x1a0] sm:$0xff]  ;;  %v366_v49 = vld [vmem:[#allocation5 + $0x1a8] sm:$0xff] }
  0x95   : > { %1249 = vmatprep.subr.bf16.mxu0 %v3379_v28  ;;  %1402 = vmatprep.subr.bf16.mxu1 %v3381_v29  ;;  %v3403_v52 = vcombine.high %v361_v46, %v365_v47  ;;  %v3405_v53 = vcombine.high %v362_v48, %v366_v49  ;;  %v369_v54 = vld [vmem:[#allocation5 + $0x1c0] sm:$0xff]  ;;  %v370_v57 = vld [vmem:[#allocation5 + $0x1c8] sm:$0xff]  ;;  %v3402_v59 = vcombine.low %v361_v46, %v365_v47 }
  0x96   : > { %v373_v55 = vld [vmem:[#allocation5 + $0x1e0] sm:$0xff]  ;;  %v374_v58 = vld [vmem:[#allocation5 + $0x1e8] sm:$0xff]  ;;  %v3404_v60 = vcombine.low %v362_v48, %v366_v49 }
  0x97   : > { %v3993_v56 = vld [vmem:[%s4526_s9 + $0x4] ss:$8 sps:$4 sm:$0xff]   ;;  %v3411_v61 = vcombine.high %v369_v54, %v373_v55  ;;  %v3413_v62 = vcombine.high %v370_v57, %v374_v58  ;;  %v3410_v3 = vcombine.low %v369_v54, %v373_v55  ;;  %v3412_v4 = vcombine.low %v370_v57, %v374_v58 }
  0x98   : > { %1250 = vmatpush1.bf16.msra.mxu0 %v3378_v34  ;;  %1403 = vmatpush1.bf16.msra.mxu1 %v3380_v35  ;;  %v377_v63 = vld [vmem:[#allocation5 + $0x200] sm:$0xff]  ;;  %v378_v1 = vld [vmem:[#allocation5 + $0x208] sm:$0xff] }
  0x99   : > { %1251 = vmatprep.subr.bf16.mxu0 %v3387_v36  ;;  %1404 = vmatprep.subr.bf16.mxu1 %v3389_v37  ;;  %v381_v0 = vld [vmem:[#allocation5 + $0x220] sm:$0xff]  ;;  %v382_v2 = vld [vmem:[#allocation5 + $0x228] sm:$0xff] }
  0x9a   : > { %1275 = vmatprep.mubr.bf16.mxu0 %v3993_v56  ;;  %1428 = vmatprep.mubr.bf16.mxu1 %v3993_v56  ;;  %v3419_v5 = vcombine.high %v377_v63, %v381_v0  ;;  %v3421_v6 = vcombine.high %v378_v1, %v382_v2  ;;  %v385_v7 = vld [vmem:[#allocation5 + $0x240] sm:$0xff]  ;;  %v386_v9 = vld [vmem:[#allocation5 + $0x248] sm:$0xff]  ;;  %v3418_v11 = vcombine.low %v377_v63, %v381_v0  ;;  %v319_v63 = vld [vmem:[#allocation5 + $0x30] sm:$0xff] }
  0x9b   : > { %v389_v8 = vld [vmem:[#allocation5 + $0x260] sm:$0xff]  ;;  %v390_v10 = vld [vmem:[#allocation5 + $0x268] sm:$0xff]  ;;  %v3420_v12 = vcombine.low %v378_v1, %v382_v2  ;;  %v316_v1 = vld [vmem:[#allocation5 + $0x18] sm:$0xff] }
  0x9c   : > { %1252 = vmatpush1.bf16.msra.mxu0 %v3386_v42  ;;  %1405 = vmatpush1.bf16.msra.mxu1 %v3388_v43  ;;  %v3427_v13 = vcombine.high %v385_v7, %v389_v8  ;;  %v393_v14 = vld [vmem:[#allocation5 + $0x280] sm:$0xff]  ;;  %v3429_v15 = vcombine.high %v386_v9, %v390_v10  ;;  %v394_v17 = vld [vmem:[#allocation5 + $0x288] sm:$0xff]  ;;  %v3426_v19 = vcombine.low %v385_v7, %v389_v8  ;;  %v320_v2 = vld [vmem:[#allocation5 + $0x38] sm:$0xff] }
  0x9d   : > { %1253 = vmatprep.subr.bf16.mxu0 %v3395_v44  ;;  %1406 = vmatprep.subr.bf16.mxu1 %v3397_v45  ;;  %v397_v16 = vld [vmem:[#allocation5 + $0x2a0] sm:$0xff]  ;;  %v398_v18 = vld [vmem:[#allocation5 + $0x2a8] sm:$0xff]  ;;  %v3428_v20 = vcombine.low %v386_v9, %v390_v10  ;;  %v327_v8 = vld [vmem:[#allocation5 + $0x70] sm:$0xff]  ;;  %v3361_v9 = vcombine.high %v316_v1, %v320_v2 }
  0x9e   : > { %v3435_v21 = vcombine.high %v393_v14, %v397_v16  ;;  %v3437_v22 = vcombine.high %v394_v17, %v398_v18  ;;  %v401_v23 = vld [vmem:[#allocation5 + $0x2c0] sm:$0xff]  ;;  %v402_v25 = vld [vmem:[#allocation5 + $0x2c8] sm:$0xff]  ;;  %v3434_v27 = vcombine.low %v393_v14, %v397_v16  ;;  %v3436_v28 = vcombine.low %v394_v17, %v398_v18  ;;  %v324_v10 = vld [vmem:[#allocation5 + $0x58] sm:$0xff] }
  0x9f   : > { %v405_v24 = vld [vmem:[#allocation5 + $0x2e0] sm:$0xff]  ;;  %v406_v26 = vld [vmem:[#allocation5 + $0x2e8] sm:$0xff]  ;;  %v331_v14 = vld [vmem:[#allocation5 + $0x90] sm:$0xff]  ;;  %v3360_v16 = vcombine.low %v316_v1, %v320_v2 }
  0xa0   : > { %1254 = vmatpush1.bf16.msra.mxu0 %v3394_v50  ;;  %1407 = vmatpush1.bf16.msra.mxu1 %v3396_v51  ;;  %v3443_v29 = vcombine.high %v401_v23, %v405_v24  ;;  %v3445_v30 = vcombine.high %v402_v25, %v406_v26  ;;  %v409_v31 = vld [vmem:[#allocation5 + $0x300] sm:$0xff]  ;;  %v410_v33 = vld [vmem:[#allocation5 + $0x308] sm:$0xff]  ;;  %v3442_v35 = vcombine.low %v401_v23, %v405_v24  ;;  %v332_v18 = vld [vmem:[#allocation5 + $0x98] sm:$0xff] }
  0xa1   : > { %1255 = vmatprep.subr.bf16.mxu0 %v3403_v52  ;;  %1408 = vmatprep.subr.bf16.mxu1 %v3405_v53  ;;  %v413_v32 = vld [vmem:[#allocation5 + $0x320] sm:$0xff]  ;;  %v414_v34 = vld [vmem:[#allocation5 + $0x328] sm:$0xff]  ;;  %v3444_v36 = vcombine.low %v402_v25, %v406_v26  ;;  %v339_v25 = vld [vmem:[#allocation5 + $0xd0] sm:$0xff] }
  0xa2   : > { %v3451_v37 = vcombine.high %v409_v31, %v413_v32  ;;  %v3453_v38 = vcombine.high %v410_v33, %v414_v34  ;;  %v417_v39 = vld [vmem:[#allocation5 + $0x340] sm:$0xff]  ;;  %v418_v41 = vld [vmem:[#allocation5 + $0x348] sm:$0xff]  ;;  %v3450_v43 = vcombine.low %v409_v31, %v413_v32  ;;  %v3452_v44 = vcombine.low %v410_v33, %v414_v34  ;;  %v343_v26 = vld [vmem:[#allocation5 + $0xf0] sm:$0xff] }
  0xa3   : > { %v421_v40 = vld [vmem:[#allocation5 + $0x360] sm:$0xff]  ;;  %v422_v42 = vld [vmem:[#allocation5 + $0x368] sm:$0xff]  ;;  %v347_v32 = vld [vmem:[#allocation5 + $0x110] sm:$0xff] }
  0xa4   : > { %1256 = vmatpush1.bf16.msra.mxu0 %v3402_v59  ;;  %1409 = vmatpush1.bf16.msra.mxu1 %v3404_v60  ;;  %v3459_v45 = vcombine.high %v417_v39, %v421_v40  ;;  %v3461_v46 = vcombine.high %v418_v41, %v422_v42  ;;  %v425_v47 = vld [vmem:[#allocation5 + $0x380] sm:$0xff]  ;;  %v426_v49 = vld [vmem:[#allocation5 + $0x388] sm:$0xff]  ;;  %v3458_v51 = vcombine.low %v417_v39, %v421_v40  ;;  %v351_v33 = vld [vmem:[#allocation5 + $0x130] sm:$0xff] }
  0xa5   : > { %1257 = vmatprep.subr.bf16.mxu0 %v3411_v61  ;;  %1410 = vmatprep.subr.bf16.mxu1 %v3413_v62  ;;  %v429_v48 = vld [vmem:[#allocation5 + $0x3a0] sm:$0xff]  ;;  %v430_v50 = vld [vmem:[#allocation5 + $0x3a8] sm:$0xff]  ;;  %v3460_v52 = vcombine.low %v418_v41, %v422_v42  ;;  %v315_v62 = vld [vmem:[#allocation5 + $0x10] sm:$0xff]  ;;  %v3391_v41 = vcombine.high %v347_v32, %v351_v33 }
  0xa6   : > { %v3467_v53 = vcombine.high %v425_v47, %v429_v48  ;;  %v3469_v54 = vcombine.high %v426_v49, %v430_v50  ;;  %v433_v55 = vld [vmem:[#allocation5 + $0x3c0] sm:$0xff]  ;;  %v434_v57 = vld [vmem:[#allocation5 + $0x3c8] sm:$0xff]  ;;  %v3466_v59 = vcombine.low %v425_v47, %v429_v48  ;;  %v3468_v60 = vcombine.low %v426_v49, %v430_v50  ;;  %v352_v39 = vld [vmem:[#allocation5 + $0x138] sm:$0xff] }
  0xa7   : > { %v437_v56 = vld [vmem:[#allocation5 + $0x3e0] sm:$0xff]  ;;  %v438_v58 = vld [vmem:[#allocation5 + $0x3e8] sm:$0xff]  ;;  %v3359_v7 = vcombine.high %v315_v62, %v319_v63  ;;  %v355_v42 = vld [vmem:[#allocation5 + $0x150] sm:$0xff]  ;;  %v3390_v49 = vcombine.low %v347_v32, %v351_v33 }
  0xa8   : > { %1258 = vmatpush1.bf16.msra.mxu0 %v3410_v3  ;;  %1411 = vmatpush1.bf16.msra.mxu1 %v3412_v4  ;;  %v3475_v61 = vcombine.high %v433_v55, %v437_v56  ;;  %v3477_v0 = vcombine.high %v434_v57, %v438_v58  ;;  %v3474_v3 = vcombine.low %v433_v55, %v437_v56  ;;  %v323_v4 = vld [vmem:[#allocation5 + $0x50] sm:$0xff]  ;;  %v4562_v40 = vld [vmem:[%s4526_s9 + $0x20] ss:$8 sps:$4 sm:$0xff]   ;;  %v360_v47 = vld [vmem:[#allocation5 + $0x178] sm:$0xff] }
  0xa9   : > { %1259 = vmatprep.subr.bf16.mxu0 %v3419_v5  ;;  %1412 = vmatprep.subr.bf16.mxu1 %v3421_v6  ;;  %v3476_v5 = vcombine.low %v434_v57, %v438_v58  ;;  %v4542_v6 = vld [vmem:[%s4526_s9] ss:$8 sps:$4 sm:$0xff]   ;;  %v3367_v17 = vcombine.high %v323_v4, %v327_v8  ;;  %v363_v50 = vld [vmem:[#allocation5 + $0x190] sm:$0xff]  ;;  %v368_v56 = vld [vmem:[#allocation5 + $0x1b8] sm:$0xff] }
  0xaa   : > { %v4572_v57 = vld [vmem:[%s4526_s9 + $0x30] ss:$8 sps:$4 sm:$0xff]  }
  0xab   : > { %v376_v1 = vld [vmem:[#allocation5 + $0x1f8] sm:$0xff] }
  0xac   : > { %1260 = vmatpush1.bf16.msra.mxu0 %v3418_v11  ;;  %1413 = vmatpush1.bf16.msra.mxu1 %v3420_v12  ;;  %v328_v11 = vld [vmem:[#allocation5 + $0x78] sm:$0xff]  ;;  %v3358_v12 = vcombine.low %v315_v62, %v319_v63 }
  0xad   : > { %1261 = vmatprep.subr.bf16.mxu0 %v3427_v13  ;;  %1414 = vmatprep.subr.bf16.mxu1 %v3429_v15  ;;  %v4545_v13 = vld [vmem:[%s4526_s9 + $0x14] ss:$8 sps:$4 sm:$0xff]   ;;  %v3368_v23 = vcombine.low %v324_v10, %v328_v11  ;;  %v4592_v33 = vld [vmem:[%s4526_s9 + $0x50] ss:$8 sps:$4 sm:$0xff]  }
  0xae   : > { %v335_v15 = vld [vmem:[#allocation5 + $0xb0] sm:$0xff]  ;;  %v400_v32 = vld [vmem:[#allocation5 + $0x2b8] sm:$0xff] }
  0xaf   : > { %v3375_v24 = vcombine.high %v331_v14, %v335_v15  ;;  %v3374_v31 = vcombine.low %v331_v14, %v335_v15  ;;  %v387_v15 = vld [vmem:[#allocation5 + $0x250] sm:$0xff] }
  0xb0   : > { %1262 = vmatpush1.bf16.msra.mxu0 %v3426_v19  ;;  %1415 = vmatpush1.bf16.msra.mxu1 %v3428_v20  ;;  %v336_v19 = vld [vmem:[#allocation5 + $0xb8] sm:$0xff]  ;;  %v3369_v20 = vcombine.high %v324_v10, %v328_v11 }
  0xb1   : > { %1263 = vmatprep.subr.bf16.mxu0 %v3435_v21  ;;  %1416 = vmatprep.subr.bf16.mxu1 %v3437_v22  ;;  %v3366_v21 = vcombine.low %v323_v4, %v327_v8  ;;  %v4550_v22 = vld [vmem:[%s4526_s9 + $0x10] ss:$8 sps:$4 sm:$0xff]   ;;  %v3376_v34 = vcombine.low %v332_v18, %v336_v19 }
  0xb2   : > { %v379_v4 = vld [vmem:[#allocation5 + $0x210] sm:$0xff]  ;;  %v380_v10 = vld [vmem:[#allocation5 + $0x218] sm:$0xff] }
  0xb3   : > { %v384_v11 = vld [vmem:[#allocation5 + $0x238] sm:$0xff] }
  0xb4   : > { %1264 = vmatpush1.bf16.msra.mxu0 %v3434_v27  ;;  %1417 = vmatpush1.bf16.msra.mxu1 %v3436_v28  ;;  %v3377_v27 = vcombine.high %v332_v18, %v336_v19  ;;  %v340_v28 = vld [vmem:[#allocation5 + $0xd8] sm:$0xff] }
  0xb5   : > { %1265 = vmatprep.subr.bf16.mxu0 %v3443_v29  ;;  %1418 = vmatprep.subr.bf16.mxu1 %v3445_v30  ;;  %v344_v29 = vld [vmem:[#allocation5 + $0xf8] sm:$0xff]  ;;  %v4555_v30 = vld [vmem:[%s4526_s9 + $0x24] ss:$8 sps:$4 sm:$0xff]  }
  0xb8   : > { %1266 = vmatpush1.bf16.msra.mxu0 %v3442_v35  ;;  %1419 = vmatpush1.bf16.msra.mxu1 %v3444_v36  ;;  %v3383_v35 = vcombine.high %v339_v25, %v343_v26  ;;  %v3385_v36 = vcombine.high %v340_v28, %v344_v29 }
  0xb9   : > { %1267 = vmatprep.subr.bf16.mxu0 %v3451_v37  ;;  %1420 = vmatprep.subr.bf16.mxu1 %v3453_v38  ;;  %v3382_v37 = vcombine.low %v339_v25, %v343_v26  ;;  %v348_v38 = vld [vmem:[#allocation5 + $0x118] sm:$0xff]  ;;  %v395_v25 = vld [vmem:[#allocation5 + $0x290] sm:$0xff] }
  0xba   : > { %v3393_v48 = vcombine.high %v348_v38, %v352_v39  ;;  %v399_v26 = vld [vmem:[#allocation5 + $0x2b0] sm:$0xff] }
  0xbc   : > { %1268 = vmatpush1.bf16.msra.mxu0 %v3450_v43  ;;  %1421 = vmatpush1.bf16.msra.mxu1 %v3452_v44  ;;  %v359_v43 = vld [vmem:[#allocation5 + $0x170] sm:$0xff]  ;;  %v3384_v44 = vcombine.low %v340_v28, %v344_v29 }
  0xbd   : > { %1269 = vmatprep.subr.bf16.mxu0 %v3459_v45  ;;  %1422 = vmatprep.subr.bf16.mxu1 %v3461_v46  ;;  %v4565_v45 = vld [vmem:[%s4526_s9 + $0x34] ss:$8 sps:$4 sm:$0xff]   ;;  %v3398_v58 = vcombine.low %v355_v42, %v359_v43 }
  0xbe   : > { %v356_v46 = vld [vmem:[#allocation5 + $0x158] sm:$0xff] }
  0xbf   : > { %v3401_v55 = vcombine.high %v356_v46, %v360_v47  ;;  %v3400_v62 = vcombine.low %v356_v46, %v360_v47 }
  0xc0   : > { %1270 = vmatpush1.bf16.msra.mxu0 %v3458_v51  ;;  %1423 = vmatpush1.bf16.msra.mxu1 %v3460_v52  ;;  %v367_v51 = vld [vmem:[#allocation5 + $0x1b0] sm:$0xff]  ;;  %v3392_v52 = vcombine.low %v348_v38, %v352_v39  ;;  %v3439_v39 = vcombine.high %v395_v25, %v399_v26 }
  0xc1   : > { %1271 = vmatprep.subr.bf16.mxu0 %v3467_v53  ;;  %1424 = vmatprep.subr.bf16.mxu1 %v3469_v54  ;;  %v3399_v53 = vcombine.high %v355_v42, %v359_v43  ;;  %v364_v54 = vld [vmem:[#allocation5 + $0x198] sm:$0xff]  ;;  %v3407_v63 = vcombine.high %v363_v50, %v367_v51 }
  0xc2   : > { %v3409_v2 = vcombine.high %v364_v54, %v368_v56  ;;  %v408_v42 = vld [vmem:[#allocation5 + $0x2f8] sm:$0xff] }
  0xc4   : > { %1272 = vmatpush1.bf16.msra.mxu0 %v3466_v59  ;;  %1425 = vmatpush1.bf16.msra.mxu1 %v3468_v60  ;;  %v371_v59 = vld [vmem:[#allocation5 + $0x1d0] sm:$0xff] }
  0xc5   : > { %1273 = vmatprep.subr.bf16.mxu0 %v3475_v61  ;;  %1426 = vmatprep.subr.bf16.mxu1 %v3477_v0  ;;  %v375_v60 = vld [vmem:[#allocation5 + $0x1f0] sm:$0xff]  ;;  %v4575_v61 = vld [vmem:[%s4526_s9 + $0x44] ss:$8 sps:$4 sm:$0xff]   ;;  %v372_v0 = vld [vmem:[#allocation5 + $0x1d8] sm:$0xff] }
  0xc6   : > { %v3415_v8 = vcombine.high %v371_v59, %v375_v60  ;;  %v3414_v14 = vcombine.low %v371_v59, %v375_v60  ;;  %v3416_v18 = vcombine.low %v372_v0, %v376_v1  ;;  %v419_v59 = vld [vmem:[#allocation5 + $0x350] sm:$0xff] }
  0xc7   : > { %v423_v60 = vld [vmem:[#allocation5 + $0x370] sm:$0xff] }
  0xc8   : > { %1274 = vmatpush1.bf16.msra.mxu0 %v3474_v3  ;;  %1427 = vmatpush1.bf16.msra.mxu1 %v3476_v5  ;;  %v3406_v3 = vcombine.low %v363_v50, %v367_v51  ;;  %v383_v5 = vld [vmem:[#allocation5 + $0x230] sm:$0xff]  ;;  %v412_v51 = vld [vmem:[#allocation5 + $0x318] sm:$0xff] }
  0xc9   : > { %1549 = vmatprep.subr.bf16.mxu0 %v3359_v7  ;;  %1702 = vmatprep.subr.bf16.mxu1 %v3361_v9  ;;  %v3408_v7 = vcombine.low %v364_v54, %v368_v56  ;;  %v3417_v9 = vcombine.high %v372_v0, %v376_v1  ;;  %v3423_v19 = vcombine.high %v379_v4, %v383_v5  ;;  %v415_v50 = vld [vmem:[#allocation5 + $0x330] sm:$0xff]  ;;  %v4602_v56 = vld [vmem:[%s4526_s9 + $0x60] ss:$8 sps:$4 sm:$0xff]   ;;  %v424_v0 = vld [vmem:[#allocation5 + $0x378] sm:$0xff] }
  0xcb   : > { %1276 = vmatmul.mubr.bf16.vlgmr.msra.gmra.mrb[0].mxu0 %v4542_v6  ;;  %1429 = vmatmul.mubr.bf16.vlgmr.msra.gmra.mrb[0].mxu1 %v4542_v6 }
  0xcc   : > { %1550 = vmatpush1.bf16.msra.mxu0 %v3358_v12  ;;  %1703 = vmatpush1.bf16.msra.mxu1 %v3360_v16  ;;  %v4582_v12 = vld [vmem:[%s4526_s9 + $0x40] ss:$8 sps:$4 sm:$0xff]   ;;  %v391_v16 = vld [vmem:[#allocation5 + $0x270] sm:$0xff] }
  0xcd   : > { %1551 = vmatprep.subr.bf16.mxu0 %v3367_v17  ;;  %1285 = vmatprep.mubr.bf16.mxu0 %v4545_v13  ;;  %v4585_v17 = vld [vmem:[%s4526_s9 + $0x54] ss:$8 sps:$4 sm:$0xff]   ;;  %v3431_v28 = vcombine.high %v387_v15, %v391_v16 }
  0xce   : > { %1438 = vmatprep.mubr.bf16.mxu1 %v4545_v13  ;;  %1704 = vmatprep.subr.bf16.mxu1 %v3369_v20  ;;  %v388_v20 = vld [vmem:[#allocation5 + $0x258] sm:$0xff] }
  0xd0   : > { %1552 = vmatpush1.bf16.msra.mxu0 %v3366_v21  ;;  %1705 = vmatpush1.bf16.msra.mxu1 %v3368_v23  ;;  %v392_v21 = vld [vmem:[#allocation5 + $0x278] sm:$0xff]  ;;  %v3425_v23 = vcombine.high %v380_v10, %v384_v11 }
  0xd1   : > { %1553 = vmatprep.subr.bf16.mxu0 %v3375_v24  ;;  %1706 = vmatprep.subr.bf16.mxu1 %v3377_v27  ;;  %v3422_v24 = vcombine.low %v379_v4, %v383_v5  ;;  %v3424_v27 = vcombine.low %v380_v10, %v384_v11  ;;  %v3433_v29 = vcombine.high %v388_v20, %v392_v21  ;;  %v427_v5 = vld [vmem:[#allocation5 + $0x390] sm:$0xff] }
  0xd2   : > { %v3432_v38 = vcombine.low %v388_v20, %v392_v21  ;;  %v3462_v10 = vcombine.low %v419_v59, %v423_v60  ;;  %v4615_v20 = vld [vmem:[%s4526_s9 + $0x84] ss:$8 sps:$4 sm:$0xff]   ;;  %v436_v21 = vld [vmem:[#allocation5 + $0x3d8] sm:$0xff] }
  0xd3   : > { %1286 = vmatmul.mubr.bf16.gmra.mrb[4].mxu0 %v4550_v22  ;;  %1439 = vmatmul.mubr.bf16.gmra.mrb[4].mxu1 %v4550_v22 }
  0xd4   : > { %1554 = vmatpush1.bf16.msra.mxu0 %v3374_v31  ;;  %1295 = vmatprep.mubr.bf16.mxu0 %v4555_v30  ;;  %v396_v31 = vld [vmem:[#allocation5 + $0x298] sm:$0xff] }
  0xd5   : > { %1448 = vmatprep.mubr.bf16.mxu1 %v4555_v30  ;;  %1707 = vmatpush1.bf16.msra.mxu1 %v3376_v34  ;;  %v3430_v34 = vcombine.low %v387_v15, %v391_v16  ;;  %v3441_v43 = vcombine.high %v396_v31, %v400_v32  ;;  %v3440_v46 = vcombine.low %v396_v31, %v400_v32  ;;  %v4612_v15 = vld [vmem:[%s4526_s9 + $0x70] ss:$8 sps:$4 sm:$0xff]   ;;  %v4029_v31 = vld [vmem:[#allocation8 + $0x40] sm:$0xff]  }
  0xd6   : > { %1555 = vmatprep.subr.bf16.mxu0 %v3383_v35  ;;  %1708 = vmatprep.subr.bf16.mxu1 %v3385_v36  ;;  %v403_v35 = vld [vmem:[#allocation5 + $0x2d0] sm:$0xff]  ;;  %v4622_v32 = vld [vmem:[%s4526_s9 + $0x80] ss:$8 sps:$4 sm:$0xff]  }
  0xd7   : > { %v407_v36 = vld [vmem:[#allocation5 + $0x2f0] sm:$0xff] }
  0xd8   : > { %1556 = vmatpush1.bf16.msra.mxu0 %v3382_v37  ;;  %v4595_v37 = vld [vmem:[%s4526_s9 + $0x64] ss:$8 sps:$4 sm:$0xff]   ;;  %v3447_v47 = vcombine.high %v403_v35, %v407_v36 }
  0xd9   : > { %1557 = vmatprep.subr.bf16.mxu0 %v3391_v41  ;;  %1709 = vmatpush1.bf16.msra.mxu1 %v3384_v44  ;;  %v404_v41 = vld [vmem:[#allocation5 + $0x2d8] sm:$0xff]  ;;  %v3438_v44 = vcombine.low %v395_v25, %v399_v26 }
  0xda   : > { %1710 = vmatprep.subr.bf16.mxu1 %v3393_v48  ;;  %v3449_v48 = vcombine.high %v404_v41, %v408_v42  ;;  %v3448_v54 = vcombine.low %v404_v41, %v408_v42  ;;  %v4645_v41 = vld [vmem:[%s4526_s9 + $0xb4] ss:$8 sps:$4 sm:$0xff]   ;;  %v4652_v42 = vld [vmem:[%s4526_s9 + $0xb0] ss:$8 sps:$4 sm:$0xff]  }
  0xdb   : > { %1296 = vmatmul.mubr.bf16.gmra.mrb[8].mxu0 %v4562_v40  ;;  %1449 = vmatmul.mubr.bf16.gmra.mrb[8].mxu1 %v4562_v40 }
  0xdc   : > { %1305 = vmatprep.mubr.bf16.mxu0 %v4565_v45  ;;  %1458 = vmatprep.mubr.bf16.mxu1 %v4565_v45 }
  0xdd   : > { %1558 = vmatpush1.bf16.msra.mxu0 %v3390_v49  ;;  %1711 = vmatpush1.bf16.msra.mxu1 %v3392_v52  ;;  %v411_v49 = vld [vmem:[#allocation5 + $0x310] sm:$0xff]  ;;  %v416_v52 = vld [vmem:[#allocation5 + $0x338] sm:$0xff] }
  0xde   : > { %1559 = vmatprep.subr.bf16.mxu0 %v3399_v53  ;;  %1712 = vmatprep.subr.bf16.mxu1 %v3401_v55  ;;  %v3446_v53 = vcombine.low %v403_v35, %v407_v36  ;;  %v3455_v55 = vcombine.high %v411_v49, %v415_v50  ;;  %v3454_v1 = vcombine.low %v411_v49, %v415_v50  ;;  %v4625_v35 = vld [vmem:[%s4526_s9 + $0x94] ss:$8 sps:$4 sm:$0xff]   ;;  %v4632_v36 = vld [vmem:[%s4526_s9 + $0x90] ss:$8 sps:$4 sm:$0xff]  }
  0xdf   : > { %v4034_v49 = vld [vmem:[#allocation8 + $0x8] sm:$0xff]  }
  0xe0   : > { %v4036_v50 = vld [vmem:[#allocation8 + $0x88] sm:$0xff]  }
  0xe1   : > { %1560 = vmatpush1.bf16.msra.mxu0 %v3398_v58  ;;  %1713 = vmatpush1.bf16.msra.mxu1 %v3400_v62  ;;  %v3457_v58 = vcombine.high %v412_v51, %v416_v52  ;;  %v4605_v62 = vld [vmem:[%s4526_s9 + $0x74] ss:$8 sps:$4 sm:$0xff]  }
  0xe2   : > { %1561 = vmatprep.subr.bf16.mxu0 %v3407_v63  ;;  %1714 = vmatprep.subr.bf16.mxu1 %v3409_v2  ;;  %v420_v63 = vld [vmem:[#allocation5 + $0x358] sm:$0xff]  ;;  %v3456_v2 = vcombine.low %v412_v51, %v416_v52 }
  0xe3   : > { %1306 = vmatmul.mubr.bf16.gmra.mrb[12].mxu0 %v4572_v57  ;;  %1459 = vmatmul.mubr.bf16.gmra.mrb[12].mxu1 %v4572_v57  ;;  %v3465_v4 = vcombine.high %v420_v63, %v424_v0  ;;  %v3464_v11 = vcombine.low %v420_v63, %v424_v0  ;;  %v4037_v51 = vld [vmem:[#allocation8 + $0x50] sm:$0xff]   ;;  %v4046_v63 = vld [vmem:[#allocation8 + $0x20] sm:$0xff]  }
  0xe4   : > { %1315 = vmatprep.mubr.bf16.mxu0 %v4575_v61  ;;  %1468 = vmatprep.mubr.bf16.mxu1 %v4575_v61  ;;  %v4039_v52 = vld [vmem:[#allocation8 + $0xd0] sm:$0xff]   ;;  %v4048_v0 = vld [vmem:[#allocation8 + $0xa0] sm:$0xff]  }
  0xe5   : > { %1562 = vmatpush1.bf16.msra.mxu0 %v3406_v3  ;;  %1715 = vmatpush1.bf16.msra.mxu1 %v3408_v7  ;;  %v3463_v3 = vcombine.high %v419_v59, %v423_v60  ;;  %v431_v7 = vld [vmem:[#allocation5 + $0x3b0] sm:$0xff]  ;;  %v4045_v59 = vld [vmem:[#allocation8 + $0x60] sm:$0xff]  }
  0xe6   : > { %1563 = vmatprep.subr.bf16.mxu0 %v3415_v8  ;;  %1716 = vmatprep.subr.bf16.mxu1 %v3417_v9  ;;  %v428_v8 = vld [vmem:[#allocation5 + $0x398] sm:$0xff]  ;;  %v4047_v60 = vld [vmem:[#allocation8 + $0xe0] sm:$0xff]  }
  0xe7   : > { %v432_v9 = vld [vmem:[#allocation5 + $0x3b8] sm:$0xff] }
  0xe8   : > { %v3473_v16 = vcombine.high %v428_v8, %v432_v9  ;;  %v3472_v25 = vcombine.low %v428_v8, %v432_v9  ;;  %v4057_v8 = vld [vmem:[#allocation8 + $0x78] sm:$0xff]  }
  0xe9   : > { %1564 = vmatpush1.bf16.msra.mxu0 %v3414_v14  ;;  %1717 = vmatpush1.bf16.msra.mxu1 %v3416_v18  ;;  %v3471_v14 = vcombine.high %v427_v5, %v431_v7  ;;  %v435_v18 = vld [vmem:[#allocation5 + $0x3d0] sm:$0xff]  ;;  %v4060_v9 = vld [vmem:[#allocation8 + $0xb8] sm:$0xff]  }
  0xea   : > { %1565 = vmatprep.subr.bf16.mxu0 %v3423_v19  ;;  %1718 = vmatprep.subr.bf16.mxu1 %v3425_v23  ;;  %v439_v19 = vld [vmem:[#allocation5 + $0x3f0] sm:$0xff]  ;;  %v440_v23 = vld [vmem:[#allocation5 + $0x3f8] sm:$0xff] }
  0xeb   : > { %1316 = vmatmul.mubr.bf16.gmra.mrb[16].mxu0 %v4582_v12  ;;  %1469 = vmatmul.mubr.bf16.gmra.mrb[16].mxu1 %v4582_v12  ;;  %v3479_v26 = vcombine.high %v435_v18, %v439_v19 }
  0xec   : > { %1325 = vmatprep.mubr.bf16.mxu0 %v4585_v17  ;;  %1478 = vmatprep.mubr.bf16.mxu1 %v4585_v17 }
  0xed   : > { %1566 = vmatpush1.bf16.msra.mxu0 %v3422_v24  ;;  %1719 = vmatpush1.bf16.msra.mxu1 %v3424_v27  ;;  %v3470_v24 = vcombine.low %v427_v5, %v431_v7  ;;  %v3481_v27 = vcombine.high %v436_v21, %v440_v23  ;;  %v4054_v5 = vld [vmem:[#allocation8 + $0x30] sm:$0xff]  }
  0xee   : > { %1567 = vmatprep.subr.bf16.mxu0 %v3431_v28  ;;  %1720 = vmatprep.subr.bf16.mxu1 %v3433_v29  ;;  %v3478_v28 = vcombine.low %v435_v18, %v439_v19  ;;  %v3480_v29 = vcombine.low %v436_v21, %v440_v23  ;;  %v4056_v7 = vld [vmem:[#allocation8 + $0xb0] sm:$0xff]  }
  0xf1   : > { %1568 = vmatpush1.bf16.msra.mxu0 %v3430_v34  ;;  %1721 = vmatpush1.bf16.msra.mxu1 %v3432_v38  ;;  %v4031_v34 = vld [vmem:[#allocation8 + $0xc0] sm:$0xff]  }
  0xf2   : > { %1569 = vmatprep.subr.bf16.mxu0 %v3439_v39  ;;  %1722 = vmatprep.subr.bf16.mxu1 %v3441_v43  ;;  %v4635_v38 = vld [vmem:[%s4526_s9 + $0xa4] ss:$8 sps:$4 sm:$0xff]   ;;  %v4642_v39 = vld [vmem:[%s4526_s9 + $0xa0] ss:$8 sps:$4 sm:$0xff]  }
  0xf3   : > { %1326 = vmatmul.mubr.bf16.gmra.mrb[20].mxu0 %v4592_v33  ;;  %1479 = vmatmul.mubr.bf16.gmra.mrb[20].mxu1 %v4592_v33  ;;  %v4093_v43 = vld [vmem:[%s4526_s9 + $0x4] ss:$8 sps:$4 sm:$0xff]  }
  0xf4   : > { %1335 = vmatprep.mubr.bf16.mxu0 %v4595_v37  ;;  %1488 = vmatprep.mubr.bf16.mxu1 %v4595_v37 }
  0xf5   : > { %1570 = vmatpush1.bf16.msra.mxu0 %v3438_v44  ;;  %1723 = vmatpush1.bf16.msra.mxu1 %v3440_v46  ;;  %v4030_v44 = vld [vmem:[#allocation8] sm:$0xff]  }
  0xf6   : > { %1571 = vmatprep.subr.bf16.mxu0 %v3447_v47  ;;  %1724 = vmatprep.subr.bf16.mxu1 %v3449_v48  ;;  %v4032_v46 = vld [vmem:[#allocation8 + $0x80] sm:$0xff]   ;;  %v4033_v47 = vld [vmem:[#allocation8 + $0x48] sm:$0xff]  }
  0xf7   : > { %v4035_v48 = vld [vmem:[#allocation8 + $0xc8] sm:$0xff]  }
  0xf9   : > { %1572 = vmatpush1.bf16.msra.mxu0 %v3446_v53  ;;  %1725 = vmatpush1.bf16.msra.mxu1 %v3448_v54  ;;  %v4038_v53 = vld [vmem:[#allocation8 + $0x10] sm:$0xff]  }
  0xfa   : > { %1573 = vmatprep.subr.bf16.mxu0 %v3455_v55  ;;  %1726 = vmatprep.subr.bf16.mxu1 %v3457_v58  ;;  %v4040_v54 = vld [vmem:[#allocation8 + $0x90] sm:$0xff]   ;;  %v4041_v55 = vld [vmem:[#allocation8 + $0x58] sm:$0xff]  }
  0xfb   : > { %1336 = vmatmul.mubr.bf16.gmra.mrb[24].mxu0 %v4602_v56  ;;  %1489 = vmatmul.mubr.bf16.gmra.mrb[24].mxu1 %v4602_v56  ;;  %v4044_v58 = vld [vmem:[#allocation8 + $0x98] sm:$0xff]  }
  0xfc   : > { %1345 = vmatprep.mubr.bf16.mxu0 %v4605_v62  ;;  %1498 = vmatprep.mubr.bf16.mxu1 %v4605_v62 }
  0xfd   : > { %1574 = vmatpush1.bf16.msra.mxu0 %v3454_v1  ;;  %1727 = vmatpush1.bf16.msra.mxu1 %v3456_v2  ;;  %v4049_v1 = vld [vmem:[#allocation8 + $0x68] sm:$0xff]  }
  0xfe   : > { %1575 = vmatprep.subr.bf16.mxu0 %v3463_v3  ;;  %1728 = vmatprep.subr.bf16.mxu1 %v3465_v4  ;;  %v4052_v2 = vld [vmem:[#allocation8 + $0xa8] sm:$0xff]   ;;  %v4053_v3 = vld [vmem:[#allocation8 + $0x70] sm:$0xff]  }
  0xff   : > { %v4055_v4 = vld [vmem:[#allocation8 + $0xf0] sm:$0xff]  }
 0x101   : > { %1576 = vmatpush1.bf16.msra.mxu0 %v3462_v10  ;;  %1729 = vmatpush1.bf16.msra.mxu1 %v3464_v11  ;;  %v4061_v10 = vld [vmem:[#allocation8 + $0x140] sm:$0xff]  }
 0x102   : > { %1577 = vmatprep.subr.bf16.mxu0 %v3471_v14  ;;  %1730 = vmatprep.subr.bf16.mxu1 %v3473_v16  ;;  %v4063_v11 = vld [vmem:[#allocation8 + $0x1c0] sm:$0xff]  }
 0x103   : > { %1346 = vmatmul.mubr.bf16.gmra.mrb[28].mxu0 %v4612_v15  ;;  %1499 = vmatmul.mubr.bf16.gmra.mrb[28].mxu1 %v4612_v15 }
 0x104   : > { %1355 = vmatprep.mubr.bf16.mxu0 %v4615_v20  ;;  %1508 = vmatprep.mubr.bf16.mxu1 %v4615_v20 }
 0x105   : > { %1578 = vmatpush1.bf16.msra.mxu0 %v3470_v24  ;;  %1731 = vmatpush1.bf16.msra.mxu1 %v3472_v25 }
 0x106   : > { %1579 = vmatprep.subr.bf16.mxu0 %v3479_v26  ;;  %1732 = vmatprep.subr.bf16.mxu1 %v3481_v27 }
 0x109   : > { %1580 = vmatpush1.bf16.msra.mxu0 %v3478_v28  ;;  %1733 = vmatpush1.bf16.msra.mxu1 %v3480_v29 }
 0x10a   : > { %3554 = vmatprep.subr.bf16.mxu0 %v4029_v31  ;;  %3642 = vmatprep.subr.bf16.mxu1 %v4031_v34 }
 0x10b   : > { %1356 = vmatmul.mubr.bf16.gmra.mrb[32].mxu0 %v4622_v32  ;;  %1509 = vmatmul.mubr.bf16.gmra.mrb[32].mxu1 %v4622_v32 }
 0x10c   : > { %1365 = vmatprep.mubr.bf16.mxu0 %v4625_v35  ;;  %1518 = vmatprep.mubr.bf16.mxu1 %v4625_v35 }
 0x113   : > { %1366 = vmatmul.mubr.bf16.gmra.mrb[36].mxu0 %v4632_v36  ;;  %1519 = vmatmul.mubr.bf16.gmra.mrb[36].mxu1 %v4632_v36 }
 0x114   : > { %1375 = vmatprep.mubr.bf16.mxu0 %v4635_v38  ;;  %1528 = vmatprep.mubr.bf16.mxu1 %v4635_v38 }
 0x11b   : > { %1376 = vmatmul.mubr.bf16.gmra.mrb[40].mxu0 %v4642_v39  ;;  %1529 = vmatmul.mubr.bf16.gmra.mrb[40].mxu1 %v4642_v39 }
 0x11c   : > { %1385 = vmatprep.mubr.bf16.mxu0 %v4645_v41  ;;  %1538 = vmatprep.mubr.bf16.mxu1 %v4645_v41 }
 0x123   : > { %1386 = vmatmul.mubr.bf16.gmra.mrb[44].mxu0 %v4652_v42  ;;  %1539 = vmatmul.mubr.bf16.gmra.mrb[44].mxu1 %v4652_v42 }
 0x124   : > { %1581 = vmatprep.mubr.bf16.mxu0 %v4093_v43  ;;  %1734 = vmatprep.mubr.bf16.mxu1 %v4093_v43 }
 0x12b   : > { %1582 = vmatmul.mubr.bf16.vlgmr.msra.gmra.mrb[48].mxu0 %v4542_v6  ;;  %1735 = vmatmul.mubr.bf16.vlgmr.msra.gmra.mrb[48].mxu1 %v4542_v6  ;;  %v4043_v6 = vld [vmem:[#allocation8 + $0xd8] sm:$0xff]  }
 0x12c   : > { %1591 = vmatprep.mubr.bf16.mxu0 %v4545_v13  ;;  %1744 = vmatprep.mubr.bf16.mxu1 %v4545_v13  ;;  %v4042_v13 = vld [vmem:[#allocation8 + $0x18] sm:$0xff]  }
 0x12d   : > { %3555 = vmatpush3.bf16.msra.mxu0 %v4030_v44  ;;  %3643 = vmatpush3.bf16.msra.mxu1 %v4032_v46 }
 0x12e   : > { %3556 = vmatprep.subr.bf16.mxu0 %v4033_v47  ;;  %3644 = vmatprep.subr.bf16.mxu1 %v4035_v48 }
 0x131   : > { %3557 = vmatpush3.bf16.msra.mxu0 %v4034_v49  ;;  %3645 = vmatpush3.bf16.msra.mxu1 %v4036_v50 }
 0x132   : > { %3558 = vmatprep.subr.bf16.mxu0 %v4037_v51  ;;  %3646 = vmatprep.subr.bf16.mxu1 %v4039_v52  ;;  %v4062_v52 = vld [vmem:[#allocation8 + $0x100] sm:$0xff]  }
 0x133   : > { %1592 = vmatmul.mubr.bf16.gmra.mrb[52].mxu0 %v4550_v22  ;;  %1745 = vmatmul.mubr.bf16.gmra.mrb[52].mxu1 %v4550_v22  ;;  %v4051_v22 = vld [vmem:[#allocation8 + $0xe8] sm:$0xff]  }
 0x134   : > { %1601 = vmatprep.mubr.bf16.mxu0 %v4555_v30  ;;  %1754 = vmatprep.mubr.bf16.mxu1 %v4555_v30  ;;  %v4050_v30 = vld [vmem:[#allocation8 + $0x28] sm:$0xff]  }
 0x135   : > { %3559 = vmatpush3.bf16.msra.mxu0 %v4038_v53  ;;  %3647 = vmatpush3.bf16.msra.mxu1 %v4040_v54 }
 0x136   : > { %3560 = vmatprep.subr.bf16.mxu0 %v4041_v55  ;;  %3648 = vmatprep.subr.bf16.mxu1 %v4043_v6 }
 0x139   : > { %3561 = vmatpush3.bf16.msra.mxu0 %v4042_v13  ;;  %3649 = vmatpush3.bf16.msra.mxu1 %v4044_v58  ;;  %v4064_v13 = vld [vmem:[#allocation8 + $0x180] sm:$0xff]   ;;  %v4065_v58 = vld [vmem:[#allocation8 + $0x148] sm:$0xff]  }
 0x13a   : > { %3562 = vmatprep.subr.bf16.mxu0 %v4045_v59  ;;  %3650 = vmatprep.subr.bf16.mxu1 %v4047_v60 }
 0x13b   : > { %1602 = vmatmul.mubr.bf16.gmra.mrb[56].mxu0 %v4562_v40  ;;  %1755 = vmatmul.mubr.bf16.gmra.mrb[56].mxu1 %v4562_v40  ;;  %v4059_v40 = vld [vmem:[#allocation8 + $0xf8] sm:$0xff]  }
 0x13c   : > { %1611 = vmatprep.mubr.bf16.mxu0 %v4565_v45  ;;  %1764 = vmatprep.mubr.bf16.mxu1 %v4565_v45  ;;  %v4058_v45 = vld [vmem:[#allocation8 + $0x38] sm:$0xff]  }
 0x13d   : > { %3563 = vmatpush3.bf16.msra.mxu0 %v4046_v63  ;;  %3651 = vmatpush3.bf16.msra.mxu1 %v4048_v0 }
 0x13e   : > { %3564 = vmatprep.subr.bf16.mxu0 %v4049_v1  ;;  %3652 = vmatprep.subr.bf16.mxu1 %v4051_v22  ;;  %v4067_v1 = vld [vmem:[#allocation8 + $0x1c8] sm:$0xff]  }
 0x141   : > { %3565 = vmatpush3.bf16.msra.mxu0 %v4050_v30  ;;  %3653 = vmatpush3.bf16.msra.mxu1 %v4052_v2 }
 0x142   : > { %3566 = vmatprep.subr.bf16.mxu0 %v4053_v3  ;;  %3654 = vmatprep.subr.bf16.mxu1 %v4055_v4 }
 0x143   : > { %1612 = vmatmul.mubr.bf16.gmra.mrb[60].mxu0 %v4572_v57  ;;  %1765 = vmatmul.mubr.bf16.gmra.mrb[60].mxu1 %v4572_v57  ;;  %v443_v57 = vlaneseq }
 0x144   : > { %1621 = vmatprep.mubr.bf16.mxu0 %v4575_v61  ;;  %1774 = vmatprep.mubr.bf16.mxu1 %v4575_v61 }
 0x145   : > { %3567 = vmatpush3.bf16.msra.mxu0 %v4054_v5  ;;  %3655 = vmatpush3.bf16.msra.mxu1 %v4056_v7  ;;  %v4703_v61 = vshrl.u32 %v443_v57, 7  ;;  %v4068_v57 = vld [vmem:[#allocation8 + $0x188] sm:$0xff]  }
 0x146   : > { %3568 = vmatprep.subr.bf16.mxu0 %v4057_v8  ;;  %3656 = vmatprep.subr.bf16.mxu1 %v4059_v40  ;;  %v4066_v40 = vld [vmem:[#allocation8 + $0x108] sm:$0xff]  }
 0x149   : > { %3569 = vmatpush3.bf16.msra.mxu0 %v4058_v45  ;;  %3657 = vmatpush3.bf16.msra.mxu1 %v4060_v9 }
 0x14a   : > { %3730 = vmatprep.subr.bf16.mxu0 %v4061_v10  ;;  %3818 = vmatprep.subr.bf16.mxu1 %v4063_v11 }
 0x14b   : > { %1622 = vmatmul.mubr.bf16.gmra.mrb[64].mxu0 %v4582_v12  ;;  %1775 = vmatmul.mubr.bf16.gmra.mrb[64].mxu1 %v4582_v12  ;;  %v445_v12 = vsub.s32 0, %v4703_v61 }
 0x14c   : > { %1631 = vmatprep.mubr.bf16.mxu0 %v4585_v17  ;;  %1784 = vmatprep.mubr.bf16.mxu1 %v4585_v17  ;;  %v4706_v17 = vld [vmem:[#allocation7] sm:$0xff] }
 0x153   : > { %1632 = vmatmul.mubr.bf16.gmra.mrb[68].mxu0 %v4592_v33  ;;  %1785 = vmatmul.mubr.bf16.gmra.mrb[68].mxu1 %v4592_v33  ;;  %v453_v33 = vsub.s32 2, %v4703_v61 }
 0x154   : > { %1641 = vmatprep.mubr.bf16.mxu0 %v4595_v37  ;;  %1794 = vmatprep.mubr.bf16.mxu1 %v4595_v37  ;;  %v449_v37 = vsub.s32 1, %v4703_v61 }
 0x155   : > { %v4715_v14 = vrot.slane %v4706_v17, %v453_v33 }
 0x15b   : > { %1642 = vmatmul.mubr.bf16.gmra.mrb[72].mxu0 %v4602_v56  ;;  %1795 = vmatmul.mubr.bf16.gmra.mrb[72].mxu1 %v4602_v56  ;;  %v457_v56 = vsub.s32 3, %v4703_v61 }
 0x15c   : > { %1651 = vmatprep.mubr.bf16.mxu0 %v4605_v62  ;;  %1804 = vmatprep.mubr.bf16.mxu1 %v4605_v62  ;;  %v4712_v62 = vrot.slane %v4706_v17, %v445_v12  ;;  %v4069_v12 = vld [vmem:[#allocation8 + $0x150] sm:$0xff]  }
 0x15d   : > { %v4721_v16 = vrot.slane %v4706_v17, %v457_v56 }
 0x163   : > { %1652 = vmatmul.mubr.bf16.gmra.mrb[76].mxu0 %v4612_v15  ;;  %1805 = vmatmul.mubr.bf16.gmra.mrb[76].mxu1 %v4612_v15  ;;  %v4718_v15 = vrot.slane %v4706_v17, %v449_v37 }
 0x164   : > { %1661 = vmatprep.mubr.bf16.mxu0 %v4615_v20  ;;  %1814 = vmatprep.mubr.bf16.mxu1 %v4615_v20 }
 0x16b   : > { %1662 = vmatmul.mubr.bf16.gmra.mrb[80].mxu0 %v4622_v32  ;;  %1815 = vmatmul.mubr.bf16.gmra.mrb[80].mxu1 %v4622_v32 }
 0x16c   : > { %1671 = vmatprep.mubr.bf16.mxu0 %v4625_v35  ;;  %1824 = vmatprep.mubr.bf16.mxu1 %v4625_v35 }
 0x173   : > { %1672 = vmatmul.mubr.bf16.gmra.mrb[84].mxu0 %v4632_v36  ;;  %1825 = vmatmul.mubr.bf16.gmra.mrb[84].mxu1 %v4632_v36 }
 0x174   : > { %1681 = vmatprep.mubr.bf16.mxu0 %v4635_v38  ;;  %1834 = vmatprep.mubr.bf16.mxu1 %v4635_v38 }
 0x17b   : > { %1682 = vmatmul.mubr.bf16.gmra.mrb[88].mxu0 %v4642_v39  ;;  %1835 = vmatmul.mubr.bf16.gmra.mrb[88].mxu1 %v4642_v39 }
 0x17c   : > { %1691 = vmatprep.mubr.bf16.mxu0 %v4645_v41  ;;  %1844 = vmatprep.mubr.bf16.mxu1 %v4645_v41 }
 0x183   : > { %1692 = vmatmul.mubr.bf16.gmra.mrb[92].mxu0 %v4652_v42  ;;  %1845 = vmatmul.mubr.bf16.gmra.mrb[92].mxu1 %v4652_v42 }
 0x19e   : > { %v1277_v18 = vpop.f32.mrb[0].mxu0  ;;  %v1430_v20 = vpop.f32.mrb[0].mxu1 }
 0x19f   : > { %v1278_v19 = vadd.f32 %v1277_v18, %v4712_v62  ;;  %v1279_v21 = vpop.f32.mrb[1].mxu0  ;;  %v1431_v23 = vadd.f32 %v1430_v20, %v4715_v14  ;;  %v1432_v25 = vpop.f32.mrb[1].mxu1  ;;  %v4071_v18 = vld [vmem:[#allocation8 + $0x1d0] sm:$0xff]  }
 0x1a0   : > { %v1280_v24 = vadd.f32 %v1279_v21, %v4718_v15  ;;  %v1281_v26 = vpop.f32.mrb[2].mxu0  ;;  %v1433_v27 = vadd.f32 %v1432_v25, %v4721_v16  ;;  %v1434_v29 = vpop.f32.mrb[2].mxu1  ;;  %v4070_v25 = vld [vmem:[#allocation8 + $0x110] sm:$0xff]  }
 0x1a1   : > { %v1282_v28 = vadd.f32 %v1281_v26, %v4712_v62  ;;  %v1283_v31 = vpop.f32.mrb[3].mxu0  ;;  %v1857_v32 = vmax.f32 %v1431_v23, 0.0  ;;  %v1435_v34 = vadd.f32 %v1434_v29, %v4715_v14  ;;  %v1436_v36 = vpop.f32.mrb[3].mxu1  ;;  %v1855_v38 = vmax.f32 %v1278_v19, 0.0 }
 0x1a2   : > { %v1284_v35 = vadd.f32 %v1283_v31, %v4718_v15  ;;  %v1858_v39 = vmax.f32 %v1433_v27, 0.0  ;;  %v1437_v42 = vadd.f32 %v1436_v36, %v4721_v16  ;;  %v1856_v43 = vmax.f32 %v1280_v24, 0.0  ;;  %v4072_v31 = vld [vmem:[#allocation8 + $0x190] sm:$0xff]  }
 0x1a3   : > { %v1863_v41 = vmax.f32 %v1282_v28, 0.0  ;;  %v1865_v44 = vmax.f32 %v1435_v34, 0.0 }
 0x1a4   : > { %v1864_v46 = vmax.f32 %v1284_v35, 0.0  ;;  %v1866_v48 = vmax.f32 %v1437_v42, 0.0 }
 0x1a5   : > { %v2047_v47 = vpack.c.bf16 %v1863_v41, %v1855_v38  ;;  %v2049_v49 = vpack.c.bf16 %v1865_v44, %v1857_v32  ;;  %v4073_v32 = vld [vmem:[#allocation8 + $0x158] sm:$0xff]  }
 0x1a6   : > { %v2048_v50 = vpack.c.bf16 %v1864_v46, %v1856_v43  ;;  %v1287_v51 = vpop.f32.mrb[4].mxu0  ;;  %v2050_v53 = vpack.c.bf16 %v1866_v48, %v1858_v39  ;;  %v1440_v55 = vpop.f32.mrb[4].mxu1  ;;  %v4075_v39 = vld [vmem:[#allocation8 + $0x1d8] sm:$0xff]  }
 0x1a7   : > { %v1288_v54 = vadd.f32 %v1287_v51, %v4712_v62  ;;  %v1289_v6 = vpop.f32.mrb[5].mxu0  ;;  %v1441_v59 = vadd.f32 %v1440_v55, %v4715_v14  ;;  %v1442_v63 = vpop.f32.mrb[5].mxu1  ;;  %v4076_v55 = vld [vmem:[#allocation8 + $0x198] sm:$0xff]  }
 0x1a8   : > { %v1290_v60 = vadd.f32 %v1289_v6, %v4718_v15  ;;  %v1291_v0 = vpop.f32.mrb[6].mxu0  ;;  %2694 = vmatprep.mubr.bf16.mxu0 %v2048_v50  ;;  %v1443_v22 = vadd.f32 %v1442_v63, %v4721_v16  ;;  %v1444_v2 = vpop.f32.mrb[6].mxu1  ;;  %2823 = vmatprep.mubr.bf16.mxu1 %v2050_v53  ;;  %v4074_v50 = vld [vmem:[#allocation8 + $0x118] sm:$0xff]   ;;  %v4077_v6 = vld [vmem:[#allocation8 + $0x160] sm:$0xff]  }
 0x1a9   : > { %v1292_v30 = vadd.f32 %v1291_v0, %v4712_v62  ;;  %v1293_v3 = vpop.f32.mrb[7].mxu0  ;;  %2695 = vmatmul.mubr.bf16.vlgmr.msra.gmra.mrb[96].mxu0 %v2047_v47  ;;  %v1873_v4 = vmax.f32 %v1441_v59, 0.0  ;;  %v1445_v5 = vadd.f32 %v1444_v2, %v4715_v14  ;;  %v1446_v8 = vpop.f32.mrb[7].mxu1  ;;  %2824 = vmatmul.mubr.bf16.vlgmr.msra.gmra.mrb[96].mxu1 %v2049_v49  ;;  %v1871_v45 = vmax.f32 %v1288_v54, 0.0  ;;  %v4078_v2 = vld [vmem:[#allocation8 + $0x120] sm:$0xff]  }
 0x1aa   : > { %v1294_v7 = vadd.f32 %v1293_v3, %v4718_v15  ;;  %3731 = vmatpush3.bf16.msra.mxu0 %v4062_v52  ;;  %v1874_v9 = vmax.f32 %v1443_v22, 0.0  ;;  %v1447_v11 = vadd.f32 %v1446_v8, %v4721_v16  ;;  %3819 = vmatpush3.bf16.msra.mxu1 %v4064_v13  ;;  %v1872_v33 = vmax.f32 %v1290_v60, 0.0  ;;  %v4079_v60 = vld [vmem:[#allocation8 + $0x1e0] sm:$0xff]  }
 0x1ab   : > { %v1879_v10 = vmax.f32 %v1292_v30, 0.0  ;;  %3732 = vmatprep.subr.bf16.mxu0 %v4065_v58  ;;  %v1881_v37 = vmax.f32 %v1445_v5, 0.0  ;;  %3820 = vmatprep.subr.bf16.mxu1 %v4067_v1  ;;  %v4080_v8 = vld [vmem:[#allocation8 + $0x1a0] sm:$0xff]  }
 0x1ac   : > { %v1880_v56 = vmax.f32 %v1294_v7, 0.0  ;;  %v1882_v20 = vmax.f32 %v1447_v11, 0.0 }
 0x1ad   : > { %v2055_v19 = vpack.c.bf16 %v1879_v10, %v1871_v45  ;;  %v2057_v21 = vpack.c.bf16 %v1881_v37, %v1873_v4 }
 0x1ae   : > { %v2056_v23 = vpack.c.bf16 %v1880_v56, %v1872_v33  ;;  %v1297_v24 = vpop.f32.mrb[8].mxu0  ;;  %3733 = vmatpush3.bf16.msra.mxu0 %v4066_v40  ;;  %v2058_v26 = vpack.c.bf16 %v1882_v20, %v1874_v9  ;;  %v1450_v28 = vpop.f32.mrb[8].mxu1  ;;  %3821 = vmatpush3.bf16.msra.mxu1 %v4068_v57  ;;  %v4081_v40 = vld [vmem:[#allocation8 + $0x168] sm:$0xff]  }
 0x1af   : > { %v1298_v27 = vadd.f32 %v1297_v24, %v4712_v62  ;;  %v1299_v29 = vpop.f32.mrb[9].mxu0  ;;  %3734 = vmatprep.subr.bf16.mxu0 %v4069_v12  ;;  %v1451_v34 = vadd.f32 %v1450_v28, %v4715_v14  ;;  %v1452_v36 = vpop.f32.mrb[9].mxu1  ;;  %3822 = vmatprep.subr.bf16.mxu1 %v4071_v18  ;;  %v4083_v57 = vld [vmem:[#allocation8 + $0x1e8] sm:$0xff]  }
 0x1b0   : > { %v1300_v35 = vadd.f32 %v1299_v29, %v4718_v15  ;;  %v1301_v38 = vpop.f32.mrb[10].mxu0  ;;  %2702 = vmatprep.mubr.bf16.mxu0 %v2056_v23  ;;  %v1453_v41 = vadd.f32 %v1452_v36, %v4721_v16  ;;  %v1454_v43 = vpop.f32.mrb[10].mxu1  ;;  %2831 = vmatprep.mubr.bf16.mxu1 %v2058_v26  ;;  %v4082_v23 = vld [vmem:[#allocation8 + $0x128] sm:$0xff]   ;;  %v4085_v29 = vld [vmem:[#allocation8 + $0x170] sm:$0xff]  }
 0x1b1   : > { %v1302_v42 = vadd.f32 %v1301_v38, %v4712_v62  ;;  %v1303_v44 = vpop.f32.mrb[11].mxu0  ;;  %2703 = vmatmul.mubr.bf16.gmra.mrb[100].mxu0 %v2055_v19  ;;  %v1889_v46 = vmax.f32 %v1451_v34, 0.0  ;;  %v1455_v47 = vadd.f32 %v1454_v43, %v4715_v14  ;;  %v1456_v49 = vpop.f32.mrb[11].mxu1  ;;  %2832 = vmatmul.mubr.bf16.gmra.mrb[100].mxu1 %v2057_v21  ;;  %v1887_v51 = vmax.f32 %v1298_v27, 0.0  ;;  %v4084_v28 = vld [vmem:[#allocation8 + $0x1a8] sm:$0xff]   ;;  %v4086_v43 = vld [vmem:[#allocation8 + $0x130] sm:$0xff]  }
 0x1b2   : > { %v1304_v48 = vadd.f32 %v1303_v44, %v4718_v15  ;;  %3735 = vmatpush3.bf16.msra.mxu0 %v4070_v25  ;;  %v1890_v52 = vmax.f32 %v1453_v41, 0.0  ;;  %v1457_v54 = vadd.f32 %v1456_v49, %v4721_v16  ;;  %3823 = vmatpush3.bf16.msra.mxu1 %v4072_v31  ;;  %v1888_v13 = vmax.f32 %v1300_v35, 0.0  ;;  %v4087_v35 = vld [vmem:[#allocation8 + $0x1f0] sm:$0xff]  }
 0x1b3   : > { %v1895_v53 = vmax.f32 %v1302_v42, 0.0  ;;  %3736 = vmatprep.subr.bf16.mxu0 %v4073_v32  ;;  %v1897_v58 = vmax.f32 %v1455_v47, 0.0  ;;  %3824 = vmatprep.subr.bf16.mxu1 %v4075_v39  ;;  %v4088_v49 = vld [vmem:[#allocation8 + $0x1b0] sm:$0xff]  }
 0x1b4   : > { %v1896_v59 = vmax.f32 %v1304_v48, 0.0  ;;  %v1898_v0 = vmax.f32 %v1457_v54, 0.0 }
 0x1b5   : > { %v2063_v63 = vpack.c.bf16 %v1895_v53, %v1887_v51  ;;  %v2065_v1 = vpack.c.bf16 %v1897_v58, %v1889_v46 }
 0x1b6   : > { %v2064_v22 = vpack.c.bf16 %v1896_v59, %v1888_v13  ;;  %v1307_v30 = vpop.f32.mrb[12].mxu0  ;;  %3737 = vmatpush3.bf16.msra.mxu0 %v4074_v50  ;;  %v2066_v3 = vpack.c.bf16 %v1898_v0, %v1890_v52  ;;  %v1460_v5 = vpop.f32.mrb[12].mxu1  ;;  %3825 = vmatpush3.bf16.msra.mxu1 %v4076_v55  ;;  %v4089_v50 = vld [vmem:[#allocation8 + $0x178] sm:$0xff]  }
 0x1b7   : > { %v1308_v4 = vadd.f32 %v1307_v30, %v4712_v62  ;;  %v1309_v7 = vpop.f32.mrb[13].mxu0  ;;  %3738 = vmatprep.subr.bf16.mxu0 %v4077_v6  ;;  %v1461_v45 = vadd.f32 %v1460_v5, %v4715_v14  ;;  %v1462_v10 = vpop.f32.mrb[13].mxu1  ;;  %3826 = vmatprep.subr.bf16.mxu1 %v4079_v60  ;;  %v4091_v55 = vld [vmem:[#allocation8 + $0x1f8] sm:$0xff]  }
 0x1b8   : > { %v1310_v9 = vadd.f32 %v1309_v7, %v4718_v15  ;;  %v1311_v11 = vpop.f32.mrb[14].mxu0  ;;  %2710 = vmatprep.mubr.bf16.mxu0 %v2064_v22  ;;  %v1463_v12 = vadd.f32 %v1462_v10, %v4721_v16  ;;  %v1464_v37 = vpop.f32.mrb[14].mxu1  ;;  %2839 = vmatprep.mubr.bf16.mxu1 %v2066_v3  ;;  %v4090_v22 = vld [vmem:[#allocation8 + $0x138] sm:$0xff]  }
 0x1b9   : > { %v1312_v33 = vadd.f32 %v1311_v11, %v4712_v62  ;;  %v1313_v56 = vpop.f32.mrb[15].mxu0  ;;  %2711 = vmatmul.mubr.bf16.gmra.mrb[104].mxu0 %v2063_v63  ;;  %v1905_v18 = vmax.f32 %v1461_v45, 0.0  ;;  %v1465_v19 = vadd.f32 %v1464_v37, %v4715_v14  ;;  %v1466_v21 = vpop.f32.mrb[15].mxu1  ;;  %2840 = vmatmul.mubr.bf16.gmra.mrb[104].mxu1 %v2065_v1  ;;  %v1903_v24 = vmax.f32 %v1308_v4, 0.0  ;;  %v4092_v5 = vld [vmem:[#allocation8 + $0x1b8] sm:$0xff]  }
 0x1ba   : > { %v1314_v20 = vadd.f32 %v1313_v56, %v4718_v15  ;;  %3739 = vmatpush3.bf16.msra.mxu0 %v4078_v2  ;;  %v1906_v25 = vmax.f32 %v1463_v12, 0.0  ;;  %v1467_v27 = vadd.f32 %v1466_v21, %v4721_v16  ;;  %3827 = vmatpush3.bf16.msra.mxu1 %v4080_v8  ;;  %v1904_v31 = vmax.f32 %v1310_v9, 0.0 }
 0x1bb   : > { %v1911_v26 = vmax.f32 %v1312_v33, 0.0  ;;  %3740 = vmatprep.subr.bf16.mxu0 %v4081_v40  ;;  %v1913_v32 = vmax.f32 %v1465_v19, 0.0  ;;  %3828 = vmatprep.subr.bf16.mxu1 %v4083_v57 }
 0x1bc   : > { %v1912_v34 = vmax.f32 %v1314_v20, 0.0  ;;  %v1914_v38 = vmax.f32 %v1467_v27, 0.0 }
 0x1bd   : > { %v2071_v36 = vpack.c.bf16 %v1911_v26, %v1903_v24  ;;  %v2073_v39 = vpack.c.bf16 %v1913_v32, %v1905_v18 }
 0x1be   : > { %v2072_v41 = vpack.c.bf16 %v1912_v34, %v1904_v31  ;;  %v1317_v42 = vpop.f32.mrb[16].mxu0  ;;  %3741 = vmatpush3.bf16.msra.mxu0 %v4082_v23  ;;  %v2074_v44 = vpack.c.bf16 %v1914_v38, %v1906_v25  ;;  %v1470_v47 = vpop.f32.mrb[16].mxu1  ;;  %3829 = vmatpush3.bf16.msra.mxu1 %v4084_v28 }
 0x1bf   : > { %v1318_v46 = vadd.f32 %v1317_v42, %v4712_v62  ;;  %v1319_v48 = vpop.f32.mrb[17].mxu0  ;;  %3742 = vmatprep.subr.bf16.mxu0 %v4085_v29  ;;  %v1471_v51 = vadd.f32 %v1470_v47, %v4715_v14  ;;  %v1472_v53 = vpop.f32.mrb[17].mxu1  ;;  %3830 = vmatprep.subr.bf16.mxu1 %v4087_v35 }
 0x1c0   : > { %v1320_v52 = vadd.f32 %v1319_v48, %v4718_v15  ;;  %v1321_v54 = vpop.f32.mrb[18].mxu0  ;;  %2718 = vmatprep.mubr.bf16.mxu0 %v2072_v41  ;;  %v1473_v6 = vadd.f32 %v1472_v53, %v4721_v16  ;;  %v1474_v58 = vpop.f32.mrb[18].mxu1  ;;  %2847 = vmatprep.mubr.bf16.mxu1 %v2074_v44 }
 0x1c1   : > { %v1322_v13 = vadd.f32 %v1321_v54, %v4712_v62  ;;  %v1323_v59 = vpop.f32.mrb[19].mxu0  ;;  %2719 = vmatmul.mubr.bf16.gmra.mrb[108].mxu0 %v2071_v36  ;;  %v1921_v60 = vmax.f32 %v1471_v51, 0.0  ;;  %v1475_v63 = vadd.f32 %v1474_v58, %v4715_v14  ;;  %v1476_v1 = vpop.f32.mrb[19].mxu1  ;;  %2848 = vmatmul.mubr.bf16.gmra.mrb[108].mxu1 %v2073_v39  ;;  %v1919_v30 = vmax.f32 %v1318_v46, 0.0 }
 0x1c2   : > { %v1324_v0 = vadd.f32 %v1323_v59, %v4718_v15  ;;  %3743 = vmatpush3.bf16.msra.mxu0 %v4086_v43  ;;  %v1922_v2 = vmax.f32 %v1473_v6, 0.0  ;;  %v1477_v4 = vadd.f32 %v1476_v1, %v4721_v16  ;;  %3831 = vmatpush3.bf16.msra.mxu1 %v4088_v49  ;;  %v1920_v7 = vmax.f32 %v1320_v52, 0.0 }
 0x1c3   : > { %v1927_v3 = vmax.f32 %v1322_v13, 0.0  ;;  %3744 = vmatprep.subr.bf16.mxu0 %v4089_v50  ;;  %v1929_v8 = vmax.f32 %v1475_v63, 0.0  ;;  %3832 = vmatprep.subr.bf16.mxu1 %v4091_v55 }
 0x1c4   : > { %v1928_v40 = vmax.f32 %v1324_v0, 0.0  ;;  %v1930_v9 = vmax.f32 %v1477_v4, 0.0 }
 0x1c5   : > { %v2079_v45 = vpack.c.bf16 %v1927_v3, %v1919_v30  ;;  %v2081_v10 = vpack.c.bf16 %v1929_v8, %v1921_v60 }
 0x1c6   : > { %v2080_v11 = vpack.c.bf16 %v1928_v40, %v1920_v7  ;;  %v1327_v57 = vpop.f32.mrb[20].mxu0  ;;  %3745 = vmatpush3.bf16.msra.mxu0 %v4090_v22  ;;  %v2082_v12 = vpack.c.bf16 %v1930_v9, %v1922_v2  ;;  %v1480_v37 = vpop.f32.mrb[20].mxu1  ;;  %3833 = vmatpush3.bf16.msra.mxu1 %v4092_v5 }
 0x1c7   : > { %v1328_v33 = vadd.f32 %v1327_v57, %v4712_v62  ;;  %v1329_v56 = vpop.f32.mrb[21].mxu0  ;;  %v1481_v18 = vadd.f32 %v1480_v37, %v4715_v14  ;;  %v1482_v20 = vpop.f32.mrb[21].mxu1 }
 0x1c8   : > { %v1330_v19 = vadd.f32 %v1329_v56, %v4718_v15  ;;  %v1331_v21 = vpop.f32.mrb[22].mxu0  ;;  %2726 = vmatprep.mubr.bf16.mxu0 %v2080_v11  ;;  %v1483_v23 = vadd.f32 %v1482_v20, %v4721_v16  ;;  %v1484_v25 = vpop.f32.mrb[22].mxu1  ;;  %2855 = vmatprep.mubr.bf16.mxu1 %v2082_v12 }
 0x1c9   : > { %v1332_v24 = vadd.f32 %v1331_v21, %v4712_v62  ;;  %v1333_v26 = vpop.f32.mrb[23].mxu0  ;;  %2727 = vmatmul.mubr.bf16.gmra.mrb[112].mxu0 %v2079_v45  ;;  %v1937_v27 = vmax.f32 %v1481_v18, 0.0  ;;  %v1485_v28 = vadd.f32 %v1484_v25, %v4715_v14  ;;  %v1486_v31 = vpop.f32.mrb[23].mxu1  ;;  %2856 = vmatmul.mubr.bf16.gmra.mrb[112].mxu1 %v2081_v10  ;;  %v1935_v32 = vmax.f32 %v1328_v33, 0.0 }
 0x1ca   : > { %v1334_v29 = vadd.f32 %v1333_v26, %v4718_v15  ;;  %v1938_v34 = vmax.f32 %v1483_v23, 0.0  ;;  %v1487_v36 = vadd.f32 %v1486_v31, %v4721_v16  ;;  %v1936_v38 = vmax.f32 %v1330_v19, 0.0 }
 0x1cb   : > { %v1943_v35 = vmax.f32 %v1332_v24, 0.0  ;;  %v1945_v39 = vmax.f32 %v1485_v28, 0.0 }
 0x1cc   : > { %v1944_v41 = vmax.f32 %v1334_v29, 0.0  ;;  %v1946_v43 = vmax.f32 %v1487_v36, 0.0 }
 0x1cd   : > { %v2087_v42 = vpack.c.bf16 %v1943_v35, %v1935_v32  ;;  %v2089_v44 = vpack.c.bf16 %v1945_v39, %v1937_v27 }
 0x1ce   : > { %v2088_v46 = vpack.c.bf16 %v1944_v41, %v1936_v38  ;;  %v1337_v47 = vpop.f32.mrb[24].mxu0  ;;  %v2090_v48 = vpack.c.bf16 %v1946_v43, %v1938_v34  ;;  %v1490_v50 = vpop.f32.mrb[24].mxu1 }
 0x1cf   : > { %v1338_v49 = vadd.f32 %v1337_v47, %v4712_v62  ;;  %v1339_v51 = vpop.f32.mrb[25].mxu0  ;;  %v1491_v52 = vadd.f32 %v1490_v50, %v4715_v14  ;;  %v1492_v54 = vpop.f32.mrb[25].mxu1 }
 0x1d0   : > { %v1340_v53 = vadd.f32 %v1339_v51, %v4718_v15  ;;  %v1341_v55 = vpop.f32.mrb[26].mxu0  ;;  %2734 = vmatprep.mubr.bf16.mxu0 %v2088_v46  ;;  %v1493_v6 = vadd.f32 %v1492_v54, %v4721_v16  ;;  %v1494_v58 = vpop.f32.mrb[26].mxu1  ;;  %2863 = vmatprep.mubr.bf16.mxu1 %v2090_v48 }
 0x1d1   : > { %v1342_v13 = vadd.f32 %v1341_v55, %v4712_v62  ;;  %v1343_v59 = vpop.f32.mrb[27].mxu0  ;;  %2735 = vmatmul.mubr.bf16.gmra.mrb[116].mxu0 %v2087_v42  ;;  %v1953_v60 = vmax.f32 %v1491_v52, 0.0  ;;  %v1495_v63 = vadd.f32 %v1494_v58, %v4715_v14  ;;  %v1496_v1 = vpop.f32.mrb[27].mxu1  ;;  %2864 = vmatmul.mubr.bf16.gmra.mrb[116].mxu1 %v2089_v44  ;;  %v1951_v22 = vmax.f32 %v1338_v49, 0.0 }
 0x1d2   : > { %v1344_v0 = vadd.f32 %v1343_v59, %v4718_v15  ;;  %v1954_v30 = vmax.f32 %v1493_v6, 0.0  ;;  %v1497_v3 = vadd.f32 %v1496_v1, %v4721_v16  ;;  %v1952_v4 = vmax.f32 %v1340_v53, 0.0 }
 0x1d3   : > { %v1959_v2 = vmax.f32 %v1342_v13, 0.0  ;;  %v1961_v5 = vmax.f32 %v1495_v63, 0.0 }
 0x1d4   : > { %v1960_v7 = vmax.f32 %v1344_v0, 0.0  ;;  %v1962_v40 = vmax.f32 %v1497_v3, 0.0 }
 0x1d5   : > { %v2095_v8 = vpack.c.bf16 %v1959_v2, %v1951_v22  ;;  %v2097_v45 = vpack.c.bf16 %v1961_v5, %v1953_v60 }
 0x1d6   : > { %v2096_v9 = vpack.c.bf16 %v1960_v7, %v1952_v4  ;;  %v1347_v10 = vpop.f32.mrb[28].mxu0  ;;  %v2098_v11 = vpack.c.bf16 %v1962_v40, %v1954_v30  ;;  %v1500_v12 = vpop.f32.mrb[28].mxu1 }
 0x1d7   : > { %v1348_v57 = vadd.f32 %v1347_v10, %v4712_v62  ;;  %v1349_v33 = vpop.f32.mrb[29].mxu0  ;;  %v1501_v37 = vadd.f32 %v1500_v12, %v4715_v14  ;;  %v1502_v18 = vpop.f32.mrb[29].mxu1 }
 0x1d8   : > { %v1350_v56 = vadd.f32 %v1349_v33, %v4718_v15  ;;  %v1351_v19 = vpop.f32.mrb[30].mxu0  ;;  %2742 = vmatprep.mubr.bf16.mxu0 %v2096_v9  ;;  %v1503_v20 = vadd.f32 %v1502_v18, %v4721_v16  ;;  %v1504_v23 = vpop.f32.mrb[30].mxu1  ;;  %2871 = vmatprep.mubr.bf16.mxu1 %v2098_v11 }
 0x1d9   : > { %v1352_v21 = vadd.f32 %v1351_v19, %v4712_v62  ;;  %v1353_v24 = vpop.f32.mrb[31].mxu0  ;;  %2743 = vmatmul.mubr.bf16.gmra.mrb[120].mxu0 %v2095_v8  ;;  %v1969_v25 = vmax.f32 %v1501_v37, 0.0  ;;  %v1505_v26 = vadd.f32 %v1504_v23, %v4715_v14  ;;  %v1506_v28 = vpop.f32.mrb[31].mxu1  ;;  %2872 = vmatmul.mubr.bf16.gmra.mrb[120].mxu1 %v2097_v45  ;;  %v1967_v29 = vmax.f32 %v1348_v57, 0.0 }
 0x1da   : > { %v1354_v27 = vadd.f32 %v1353_v24, %v4718_v15  ;;  %v1970_v31 = vmax.f32 %v1503_v20, 0.0  ;;  %v1507_v34 = vadd.f32 %v1506_v28, %v4721_v16  ;;  %v1968_v35 = vmax.f32 %v1350_v56, 0.0 }
 0x1db   : > { %v1975_v32 = vmax.f32 %v1352_v21, 0.0  ;;  %v1977_v36 = vmax.f32 %v1505_v26, 0.0 }
 0x1dc   : > { %v1976_v38 = vmax.f32 %v1354_v27, 0.0  ;;  %v1978_v41 = vmax.f32 %v1507_v34, 0.0 }
 0x1dd   : > { %v2103_v39 = vpack.c.bf16 %v1975_v32, %v1967_v29  ;;  %v2105_v42 = vpack.c.bf16 %v1977_v36, %v1969_v25 }
 0x1de   : > { %v2104_v43 = vpack.c.bf16 %v1976_v38, %v1968_v35  ;;  %v1357_v44 = vpop.f32.mrb[32].mxu0  ;;  %v2106_v46 = vpack.c.bf16 %v1978_v41, %v1970_v31  ;;  %v1510_v48 = vpop.f32.mrb[32].mxu1 }
 0x1df   : > { %v1358_v47 = vadd.f32 %v1357_v44, %v4712_v62  ;;  %v1359_v49 = vpop.f32.mrb[33].mxu0  ;;  %v1511_v50 = vadd.f32 %v1510_v48, %v4715_v14  ;;  %v1512_v52 = vpop.f32.mrb[33].mxu1 }
 0x1e0   : > { %v1360_v51 = vadd.f32 %v1359_v49, %v4718_v15  ;;  %v1361_v53 = vpop.f32.mrb[34].mxu0  ;;  %2750 = vmatprep.mubr.bf16.mxu0 %v2104_v43  ;;  %v1513_v54 = vadd.f32 %v1512_v52, %v4721_v16  ;;  %v1514_v6 = vpop.f32.mrb[34].mxu1  ;;  %2879 = vmatprep.mubr.bf16.mxu1 %v2106_v46 }
 0x1e1   : > { %v1362_v55 = vadd.f32 %v1361_v53, %v4712_v62  ;;  %v1363_v13 = vpop.f32.mrb[35].mxu0  ;;  %2751 = vmatmul.mubr.bf16.gmra.mrb[124].mxu0 %v2103_v39  ;;  %v1985_v58 = vmax.f32 %v1511_v50, 0.0  ;;  %v1515_v59 = vadd.f32 %v1514_v6, %v4715_v14  ;;  %v1516_v63 = vpop.f32.mrb[35].mxu1  ;;  %2880 = vmatmul.mubr.bf16.gmra.mrb[124].mxu1 %v2105_v42  ;;  %v1983_v0 = vmax.f32 %v1358_v47, 0.0 }
 0x1e2   : > { %v1364_v60 = vadd.f32 %v1363_v13, %v4718_v15  ;;  %v1986_v1 = vmax.f32 %v1513_v54, 0.0  ;;  %v1517_v30 = vadd.f32 %v1516_v63, %v4721_v16  ;;  %v1984_v2 = vmax.f32 %v1360_v51, 0.0 }
 0x1e3   : > { %v1991_v22 = vmax.f32 %v1362_v55, 0.0  ;;  %v1993_v3 = vmax.f32 %v1515_v59, 0.0 }
 0x1e4   : > { %v1992_v4 = vmax.f32 %v1364_v60, 0.0  ;;  %v1994_v7 = vmax.f32 %v1517_v30, 0.0 }
 0x1e5   : > { %v2111_v5 = vpack.c.bf16 %v1991_v22, %v1983_v0  ;;  %v2113_v8 = vpack.c.bf16 %v1993_v3, %v1985_v58 }
 0x1e6   : > { %v2112_v40 = vpack.c.bf16 %v1992_v4, %v1984_v2  ;;  %v1367_v45 = vpop.f32.mrb[36].mxu0  ;;  %v2114_v9 = vpack.c.bf16 %v1994_v7, %v1986_v1  ;;  %v1520_v11 = vpop.f32.mrb[36].mxu1 }
 0x1e7   : > { %v1368_v10 = vadd.f32 %v1367_v45, %v4712_v62  ;;  %v1369_v57 = vpop.f32.mrb[37].mxu0  ;;  %v1521_v12 = vadd.f32 %v1520_v11, %v4715_v14  ;;  %v1522_v37 = vpop.f32.mrb[37].mxu1  ;;  %v465_v45 = vsub.s32 5, %v4703_v61 }
 0x1e8   : > { %v1370_v33 = vadd.f32 %v1369_v57, %v4718_v15  ;;  %v1371_v56 = vpop.f32.mrb[38].mxu0  ;;  %2758 = vmatprep.mubr.bf16.mxu0 %v2112_v40  ;;  %v1523_v18 = vadd.f32 %v1522_v37, %v4721_v16  ;;  %v1524_v20 = vpop.f32.mrb[38].mxu1  ;;  %2887 = vmatprep.mubr.bf16.mxu1 %v2114_v9 }
 0x1e9   : > { %v1372_v19 = vadd.f32 %v1371_v56, %v4712_v62  ;;  %v1373_v21 = vpop.f32.mrb[39].mxu0  ;;  %2759 = vmatmul.mubr.bf16.gmra.mrb[128].mxu0 %v2111_v5  ;;  %v2001_v23 = vmax.f32 %v1521_v12, 0.0  ;;  %v1525_v24 = vadd.f32 %v1524_v20, %v4715_v14  ;;  %v1526_v26 = vpop.f32.mrb[39].mxu1  ;;  %2888 = vmatmul.mubr.bf16.gmra.mrb[128].mxu1 %v2113_v8  ;;  %v1999_v27 = vmax.f32 %v1368_v10, 0.0 }
 0x1ea   : > { %v1374_v25 = vadd.f32 %v1373_v21, %v4718_v15  ;;  %v2002_v28 = vmax.f32 %v1523_v18, 0.0  ;;  %v1527_v31 = vadd.f32 %v1526_v26, %v4721_v16  ;;  %v2000_v32 = vmax.f32 %v1370_v33, 0.0 }
 0x1eb   : > { %v2007_v29 = vmax.f32 %v1372_v19, 0.0  ;;  %v2009_v34 = vmax.f32 %v1525_v24, 0.0  ;;  %v461_v5 = vsub.s32 4, %v4703_v61  ;;  %v469_v18 = vsub.s32 6, %v4703_v61 }
 0x1ec   : > { %v2008_v35 = vmax.f32 %v1374_v25, 0.0  ;;  %v2010_v38 = vmax.f32 %v1527_v31, 0.0  ;;  %v473_v25 = vsub.s32 7, %v4703_v61  ;;  %v4826_v31 = vrot.slane %v4706_v17, %v465_v45 }
 0x1ed   : > { %v2119_v36 = vpack.c.bf16 %v2007_v29, %v1999_v27  ;;  %v2121_v39 = vpack.c.bf16 %v2009_v34, %v2001_v23  ;;  %v4820_v24 = vrot.slane %v4706_v17, %v461_v5  ;;  %v4830_v61 = vrot.slane %v4706_v17, %v469_v18 }
 0x1ee   : > { %v2120_v41 = vpack.c.bf16 %v2008_v35, %v2000_v32  ;;  %v1377_v42 = vpop.f32.mrb[40].mxu0  ;;  %v2122_v43 = vpack.c.bf16 %v2010_v38, %v2002_v28  ;;  %v1530_v46 = vpop.f32.mrb[40].mxu1 }
 0x1ef   : > { %v1378_v44 = vadd.f32 %v1377_v42, %v4712_v62  ;;  %v1379_v47 = vpop.f32.mrb[41].mxu0  ;;  %v1531_v48 = vadd.f32 %v1530_v46, %v4715_v14  ;;  %v1532_v50 = vpop.f32.mrb[41].mxu1 }
 0x1f0   : > { %v1380_v49 = vadd.f32 %v1379_v47, %v4718_v15  ;;  %v1381_v51 = vpop.f32.mrb[42].mxu0  ;;  %2766 = vmatprep.mubr.bf16.mxu0 %v2120_v41  ;;  %v1533_v52 = vadd.f32 %v1532_v50, %v4721_v16  ;;  %v1534_v54 = vpop.f32.mrb[42].mxu1  ;;  %2895 = vmatprep.mubr.bf16.mxu1 %v2122_v43 }
 0x1f1   : > { %v1382_v53 = vadd.f32 %v1381_v51, %v4712_v62  ;;  %v1383_v55 = vpop.f32.mrb[43].mxu0  ;;  %2767 = vmatmul.mubr.bf16.gmra.mrb[132].mxu0 %v2119_v36  ;;  %v2017_v6 = vmax.f32 %v1531_v48, 0.0  ;;  %v1535_v13 = vadd.f32 %v1534_v54, %v4715_v14  ;;  %v1536_v59 = vpop.f32.mrb[43].mxu1  ;;  %2896 = vmatmul.mubr.bf16.gmra.mrb[132].mxu1 %v2121_v39  ;;  %v2015_v60 = vmax.f32 %v1378_v44, 0.0 }
 0x1f2   : > { %v1384_v58 = vadd.f32 %v1383_v55, %v4718_v15  ;;  %v2018_v63 = vmax.f32 %v1533_v52, 0.0  ;;  %v1537_v1 = vadd.f32 %v1536_v59, %v4721_v16  ;;  %v2016_v22 = vmax.f32 %v1380_v49, 0.0 }
 0x1f3   : > { %v2023_v0 = vmax.f32 %v1382_v53, 0.0  ;;  %v2025_v30 = vmax.f32 %v1535_v13, 0.0 }
 0x1f4   : > { %v2024_v2 = vmax.f32 %v1384_v58, 0.0  ;;  %v2026_v4 = vmax.f32 %v1537_v1, 0.0 }
 0x1f5   : > { %v2127_v3 = vpack.c.bf16 %v2023_v0, %v2015_v60  ;;  %v2129_v7 = vpack.c.bf16 %v2025_v30, %v2017_v6 }
 0x1f6   : > { %v2128_v8 = vpack.c.bf16 %v2024_v2, %v2016_v22  ;;  %v1387_v40 = vpop.f32.mrb[44].mxu0  ;;  %v2130_v9 = vpack.c.bf16 %v2026_v4, %v2018_v63  ;;  %v1540_v11 = vpop.f32.mrb[44].mxu1 }
 0x1f7   : > { %v1388_v10 = vadd.f32 %v1387_v40, %v4712_v62  ;;  %v1389_v57 = vpop.f32.mrb[45].mxu0  ;;  %v1541_v12 = vadd.f32 %v1540_v11, %v4715_v14  ;;  %v1542_v37 = vpop.f32.mrb[45].mxu1 }
 0x1f8   : > { %v1390_v33 = vadd.f32 %v1389_v57, %v4718_v15  ;;  %v1391_v56 = vpop.f32.mrb[46].mxu0  ;;  %2774 = vmatprep.mubr.bf16.mxu0 %v2128_v8  ;;  %v1543_v19 = vadd.f32 %v1542_v37, %v4721_v16  ;;  %v1544_v21 = vpop.f32.mrb[46].mxu1  ;;  %2903 = vmatprep.mubr.bf16.mxu1 %v2130_v9 }
 0x1f9   : > { %v1392_v20 = vadd.f32 %v1391_v56, %v4712_v62  ;;  %v1393_v23 = vpop.f32.mrb[47].mxu0  ;;  %2775 = vmatmul.mubr.bf16.gmra.mrb[136].mxu0 %v2127_v3  ;;  %v2033_v26 = vmax.f32 %v1541_v12, 0.0  ;;  %v1545_v27 = vadd.f32 %v1544_v21, %v4715_v14  ;;  %v1546_v29 = vpop.f32.mrb[47].mxu1  ;;  %2904 = vmatmul.mubr.bf16.gmra.mrb[136].mxu1 %v2129_v7  ;;  %v2031_v62 = vmax.f32 %v1388_v10, 0.0 }
 0x1fa   : > { %v1394_v28 = vadd.f32 %v1393_v23, %v4718_v15  ;;  %v2034_v32 = vmax.f32 %v1543_v19, 0.0  ;;  %v1547_v35 = vadd.f32 %v1546_v29, %v4721_v16  ;;  %v2032_v36 = vmax.f32 %v1390_v33, 0.0 }
 0x1fb   : > { %v2039_v34 = vmax.f32 %v1392_v20, 0.0  ;;  %v2041_v38 = vmax.f32 %v1545_v27, 0.0  ;;  %v4833_v15 = vrot.slane %v4706_v17, %v473_v25 }
 0x1fc   : > { %v2040_v39 = vmax.f32 %v1394_v28, 0.0  ;;  %v2042_v14 = vmax.f32 %v1547_v35, 0.0 }
 0x1fd   : > { %v2135_v41 = vpack.c.bf16 %v2039_v34, %v2031_v62  ;;  %v2137_v42 = vpack.c.bf16 %v2041_v38, %v2033_v26 }
 0x1fe   : > { %v2136_v43 = vpack.c.bf16 %v2040_v39, %v2032_v36  ;;  %v1583_v44 = vpop.f32.mrb[48].mxu0  ;;  %v2138_v46 = vpack.c.bf16 %v2042_v14, %v2034_v32  ;;  %v1736_v48 = vpop.f32.mrb[48].mxu1 }
 0x1ff   : > { %v1584_v47 = vadd.f32 %v1583_v44, %v4820_v24  ;;  %v1585_v49 = vpop.f32.mrb[49].mxu0  ;;  %v1737_v16 = vadd.f32 %v1736_v48, %v4830_v61  ;;  %v1738_v51 = vpop.f32.mrb[49].mxu1 }
 0x200   : > { %v1586_v50 = vadd.f32 %v1585_v49, %v4826_v31  ;;  %v1587_v52 = vpop.f32.mrb[50].mxu0  ;;  %2782 = vmatprep.mubr.bf16.mxu0 %v2136_v43  ;;  %v1739_v53 = vadd.f32 %v1738_v51, %v4833_v15  ;;  %v1740_v54 = vpop.f32.mrb[50].mxu1  ;;  %2911 = vmatprep.mubr.bf16.mxu1 %v2138_v46 }
 0x201   : > { %v1588_v17 = vadd.f32 %v1587_v52, %v4820_v24  ;;  %v1589_v55 = vpop.f32.mrb[51].mxu0  ;;  %2783 = vmatmul.mubr.bf16.gmra.mrb[140].mxu0 %v2135_v41  ;;  %v1861_v6 = vmax.f32 %v1737_v16, 0.0  ;;  %v1741_v13 = vadd.f32 %v1740_v54, %v4830_v61  ;;  %v1742_v59 = vpop.f32.mrb[51].mxu1  ;;  %2912 = vmatmul.mubr.bf16.gmra.mrb[140].mxu1 %v2137_v42  ;;  %v1859_v60 = vmax.f32 %v1584_v47, 0.0 }
 0x202   : > { %v1590_v58 = vadd.f32 %v1589_v55, %v4826_v31  ;;  %v1862_v63 = vmax.f32 %v1739_v53, 0.0  ;;  %v1743_v1 = vadd.f32 %v1742_v59, %v4833_v15  ;;  %v1860_v22 = vmax.f32 %v1586_v50, 0.0 }
 0x203   : > { %v1867_v0 = vmax.f32 %v1588_v17, 0.0  ;;  %v1869_v30 = vmax.f32 %v1741_v13, 0.0 }
 0x204   : > { %v1868_v2 = vmax.f32 %v1590_v58, 0.0  ;;  %v1870_v4 = vmax.f32 %v1743_v1, 0.0 }
 0x205   : > { %v2051_v3 = vpack.c.bf16 %v1867_v0, %v1859_v60  ;;  %v2053_v5 = vpack.c.bf16 %v1869_v30, %v1861_v6 }
 0x206   : > { %v2052_v7 = vpack.c.bf16 %v1868_v2, %v1860_v22  ;;  %v1593_v8 = vpop.f32.mrb[52].mxu0  ;;  %v2054_v40 = vpack.c.bf16 %v1870_v4, %v1862_v63  ;;  %v1746_v9 = vpop.f32.mrb[52].mxu1 }
 0x207   : > { %v1594_v45 = vadd.f32 %v1593_v8, %v4820_v24  ;;  %v1595_v10 = vpop.f32.mrb[53].mxu0  ;;  %v1747_v11 = vadd.f32 %v1746_v9, %v4830_v61  ;;  %v1748_v12 = vpop.f32.mrb[53].mxu1 }
 0x208   : > { %v1596_v57 = vadd.f32 %v1595_v10, %v4826_v31  ;;  %v1597_v33 = vpop.f32.mrb[54].mxu0  ;;  %2952 = vmatprep.mubr.bf16.mxu0 %v2052_v7  ;;  %v1749_v37 = vadd.f32 %v1748_v12, %v4833_v15  ;;  %v1750_v18 = vpop.f32.mrb[54].mxu1  ;;  %3081 = vmatprep.mubr.bf16.mxu1 %v2054_v40 }
 0x209   : > { %v1598_v56 = vadd.f32 %v1597_v33, %v4820_v24  ;;  %v1599_v19 = vpop.f32.mrb[55].mxu0  ;;  %2953 = vmatmul.mubr.bf16.vlgmr.msra.gmra.mrb[144].mxu0 %v2051_v3  ;;  %v1877_v20 = vmax.f32 %v1747_v11, 0.0  ;;  %v1751_v21 = vadd.f32 %v1750_v18, %v4830_v61  ;;  %v1752_v25 = vpop.f32.mrb[55].mxu1  ;;  %3082 = vmatmul.mubr.bf16.vlgmr.msra.gmra.mrb[144].mxu1 %v2053_v5  ;;  %v1875_v26 = vmax.f32 %v1594_v45, 0.0 }
 0x20a   : > { %v1600_v23 = vadd.f32 %v1599_v19, %v4826_v31  ;;  %v1878_v27 = vmax.f32 %v1749_v37, 0.0  ;;  %v1753_v29 = vadd.f32 %v1752_v25, %v4833_v15  ;;  %v1876_v62 = vmax.f32 %v1596_v57, 0.0 }
 0x20b   : > { %v1883_v28 = vmax.f32 %v1598_v56, 0.0  ;;  %v1885_v32 = vmax.f32 %v1751_v21, 0.0 }
 0x20c   : > { %v1884_v34 = vmax.f32 %v1600_v23, 0.0  ;;  %v1886_v36 = vmax.f32 %v1753_v29, 0.0 }
 0x20d   : > { %v2059_v35 = vpack.c.bf16 %v1883_v28, %v1875_v26  ;;  %v2061_v38 = vpack.c.bf16 %v1885_v32, %v1877_v20 }
 0x20e   : > { %v2060_v39 = vpack.c.bf16 %v1884_v34, %v1876_v62  ;;  %v1603_v41 = vpop.f32.mrb[56].mxu0  ;;  %v2062_v14 = vpack.c.bf16 %v1886_v36, %v1878_v27  ;;  %v1756_v43 = vpop.f32.mrb[56].mxu1 }
 0x20f   : > { %v1604_v42 = vadd.f32 %v1603_v41, %v4820_v24  ;;  %v1605_v44 = vpop.f32.mrb[57].mxu0  ;;  %v1757_v46 = vadd.f32 %v1756_v43, %v4830_v61  ;;  %v1758_v48 = vpop.f32.mrb[57].mxu1 }
 0x210   : > { %v1606_v47 = vadd.f32 %v1605_v44, %v4826_v31  ;;  %v1607_v49 = vpop.f32.mrb[58].mxu0  ;;  %2960 = vmatprep.mubr.bf16.mxu0 %v2060_v39  ;;  %v1759_v16 = vadd.f32 %v1758_v48, %v4833_v15  ;;  %v1760_v51 = vpop.f32.mrb[58].mxu1  ;;  %3089 = vmatprep.mubr.bf16.mxu1 %v2062_v14 }
 0x211   : > { %v1608_v50 = vadd.f32 %v1607_v49, %v4820_v24  ;;  %v1609_v52 = vpop.f32.mrb[59].mxu0  ;;  %2961 = vmatmul.mubr.bf16.gmra.mrb[148].mxu0 %v2059_v35  ;;  %v1893_v53 = vmax.f32 %v1757_v46, 0.0  ;;  %v1761_v17 = vadd.f32 %v1760_v51, %v4830_v61  ;;  %v1762_v55 = vpop.f32.mrb[59].mxu1  ;;  %3090 = vmatmul.mubr.bf16.gmra.mrb[148].mxu1 %v2061_v38  ;;  %v1891_v6 = vmax.f32 %v1604_v42, 0.0 }
 0x212   : > { %v1610_v54 = vadd.f32 %v1609_v52, %v4826_v31  ;;  %v1894_v13 = vmax.f32 %v1759_v16, 0.0  ;;  %v1763_v59 = vadd.f32 %v1762_v55, %v4833_v15  ;;  %v1892_v60 = vmax.f32 %v1606_v47, 0.0 }
 0x213   : > { %v1899_v58 = vmax.f32 %v1608_v50, 0.0  ;;  %v1901_v63 = vmax.f32 %v1761_v17, 0.0 }
 0x214   : > { %v1900_v0 = vmax.f32 %v1610_v54, 0.0  ;;  %v1902_v22 = vmax.f32 %v1763_v59, 0.0 }
 0x215   : > { %v2067_v1 = vpack.c.bf16 %v1899_v58, %v1891_v6  ;;  %v2069_v30 = vpack.c.bf16 %v1901_v63, %v1893_v53 }
 0x216   : > { %v2068_v2 = vpack.c.bf16 %v1900_v0, %v1892_v60  ;;  %v1613_v3 = vpop.f32.mrb[60].mxu0  ;;  %v2070_v4 = vpack.c.bf16 %v1902_v22, %v1894_v13  ;;  %v1766_v7 = vpop.f32.mrb[60].mxu1 }
 0x217   : > { %v1614_v5 = vadd.f32 %v1613_v3, %v4820_v24  ;;  %v1615_v8 = vpop.f32.mrb[61].mxu0  ;;  %v1767_v40 = vadd.f32 %v1766_v7, %v4830_v61  ;;  %v1768_v9 = vpop.f32.mrb[61].mxu1 }
 0x218   : > { %v1616_v45 = vadd.f32 %v1615_v8, %v4826_v31  ;;  %v1617_v10 = vpop.f32.mrb[62].mxu0  ;;  %2968 = vmatprep.mubr.bf16.mxu0 %v2068_v2  ;;  %v1769_v11 = vadd.f32 %v1768_v9, %v4833_v15  ;;  %v1770_v12 = vpop.f32.mrb[62].mxu1  ;;  %3097 = vmatprep.mubr.bf16.mxu1 %v2070_v4 }
 0x219   : > { %v1618_v57 = vadd.f32 %v1617_v10, %v4820_v24  ;;  %v1619_v33 = vpop.f32.mrb[63].mxu0  ;;  %2969 = vmatmul.mubr.bf16.gmra.mrb[152].mxu0 %v2067_v1  ;;  %v1909_v37 = vmax.f32 %v1767_v40, 0.0  ;;  %v1771_v56 = vadd.f32 %v1770_v12, %v4830_v61  ;;  %v1772_v19 = vpop.f32.mrb[63].mxu1  ;;  %3098 = vmatmul.mubr.bf16.gmra.mrb[152].mxu1 %v2069_v30  ;;  %v1907_v20 = vmax.f32 %v1614_v5, 0.0 }
 0x21a   : > { %v1620_v18 = vadd.f32 %v1619_v33, %v4826_v31  ;;  %v1910_v21 = vmax.f32 %v1769_v11, 0.0  ;;  %v1773_v25 = vadd.f32 %v1772_v19, %v4833_v15  ;;  %v1908_v26 = vmax.f32 %v1616_v45, 0.0 }
 0x21b   : > { %v1915_v23 = vmax.f32 %v1618_v57, 0.0  ;;  %v1917_v27 = vmax.f32 %v1771_v56, 0.0 }
 0x21c   : > { %v1916_v28 = vmax.f32 %v1620_v18, 0.0  ;;  %v1918_v62 = vmax.f32 %v1773_v25, 0.0 }
 0x21d   : > { %v2075_v29 = vpack.c.bf16 %v1915_v23, %v1907_v20  ;;  %v2077_v32 = vpack.c.bf16 %v1917_v27, %v1909_v37 }
 0x21e   : > { %v2076_v34 = vpack.c.bf16 %v1916_v28, %v1908_v26  ;;  %v1623_v35 = vpop.f32.mrb[64].mxu0  ;;  %v2078_v36 = vpack.c.bf16 %v1918_v62, %v1910_v21  ;;  %v1776_v39 = vpop.f32.mrb[64].mxu1 }
 0x21f   : > { %v1624_v38 = vadd.f32 %v1623_v35, %v4820_v24  ;;  %v1625_v41 = vpop.f32.mrb[65].mxu0  ;;  %v1777_v14 = vadd.f32 %v1776_v39, %v4830_v61  ;;  %v1778_v43 = vpop.f32.mrb[65].mxu1 }
 0x220   : > { %v1626_v42 = vadd.f32 %v1625_v41, %v4826_v31  ;;  %v1627_v44 = vpop.f32.mrb[66].mxu0  ;;  %2976 = vmatprep.mubr.bf16.mxu0 %v2076_v34  ;;  %v1779_v46 = vadd.f32 %v1778_v43, %v4833_v15  ;;  %v1780_v48 = vpop.f32.mrb[66].mxu1  ;;  %3105 = vmatprep.mubr.bf16.mxu1 %v2078_v36 }
 0x221   : > { %v1628_v47 = vadd.f32 %v1627_v44, %v4820_v24  ;;  %v1629_v49 = vpop.f32.mrb[67].mxu0  ;;  %2977 = vmatmul.mubr.bf16.gmra.mrb[156].mxu0 %v2075_v29  ;;  %v1925_v16 = vmax.f32 %v1777_v14, 0.0  ;;  %v1781_v50 = vadd.f32 %v1780_v48, %v4830_v61  ;;  %v1782_v52 = vpop.f32.mrb[67].mxu1  ;;  %3106 = vmatmul.mubr.bf16.gmra.mrb[156].mxu1 %v2077_v32  ;;  %v1923_v53 = vmax.f32 %v1624_v38, 0.0 }
 0x222   : > { %v1630_v51 = vadd.f32 %v1629_v49, %v4826_v31  ;;  %v1926_v17 = vmax.f32 %v1779_v46, 0.0  ;;  %v1783_v55 = vadd.f32 %v1782_v52, %v4833_v15  ;;  %v1924_v6 = vmax.f32 %v1626_v42, 0.0 }
 0x223   : > { %v1931_v54 = vmax.f32 %v1628_v47, 0.0  ;;  %v1933_v13 = vmax.f32 %v1781_v50, 0.0 }
 0x224   : > { %v1932_v58 = vmax.f32 %v1630_v51, 0.0  ;;  %v1934_v60 = vmax.f32 %v1783_v55, 0.0 }
 0x225   : > { %v2083_v59 = vpack.c.bf16 %v1931_v54, %v1923_v53  ;;  %v2085_v63 = vpack.c.bf16 %v1933_v13, %v1925_v16 }
 0x226   : > { %v2084_v0 = vpack.c.bf16 %v1932_v58, %v1924_v6  ;;  %v1633_v1 = vpop.f32.mrb[68].mxu0  ;;  %v2086_v22 = vpack.c.bf16 %v1934_v60, %v1926_v17  ;;  %v1786_v2 = vpop.f32.mrb[68].mxu1 }
 0x227   : > { %v1634_v30 = vadd.f32 %v1633_v1, %v4820_v24  ;;  %v1635_v3 = vpop.f32.mrb[69].mxu0  ;;  %v1787_v4 = vadd.f32 %v1786_v2, %v4830_v61  ;;  %v1788_v7 = vpop.f32.mrb[69].mxu1 }
 0x228   : > { %v1636_v5 = vadd.f32 %v1635_v3, %v4826_v31  ;;  %v1637_v8 = vpop.f32.mrb[70].mxu0  ;;  %2984 = vmatprep.mubr.bf16.mxu0 %v2084_v0  ;;  %v1789_v40 = vadd.f32 %v1788_v7, %v4833_v15  ;;  %v1790_v9 = vpop.f32.mrb[70].mxu1  ;;  %3113 = vmatprep.mubr.bf16.mxu1 %v2086_v22 }
 0x229   : > { %v1638_v45 = vadd.f32 %v1637_v8, %v4820_v24  ;;  %v1639_v10 = vpop.f32.mrb[71].mxu0  ;;  %2985 = vmatmul.mubr.bf16.gmra.mrb[160].mxu0 %v2083_v59  ;;  %v1941_v11 = vmax.f32 %v1787_v4, 0.0  ;;  %v1791_v57 = vadd.f32 %v1790_v9, %v4830_v61  ;;  %v1792_v33 = vpop.f32.mrb[71].mxu1  ;;  %3114 = vmatmul.mubr.bf16.gmra.mrb[160].mxu1 %v2085_v63  ;;  %v1939_v37 = vmax.f32 %v1634_v30, 0.0 }
 0x22a   : > { %v1640_v12 = vadd.f32 %v1639_v10, %v4826_v31  ;;  %v1942_v56 = vmax.f32 %v1789_v40, 0.0  ;;  %v1793_v19 = vadd.f32 %v1792_v33, %v4833_v15  ;;  %v1940_v20 = vmax.f32 %v1636_v5, 0.0 }
 0x22b   : > { %v1947_v18 = vmax.f32 %v1638_v45, 0.0  ;;  %v1949_v21 = vmax.f32 %v1791_v57, 0.0 }
 0x22c   : > { %v1948_v23 = vmax.f32 %v1640_v12, 0.0  ;;  %v1950_v26 = vmax.f32 %v1793_v19, 0.0 }
 0x22d   : > { %v2091_v25 = vpack.c.bf16 %v1947_v18, %v1939_v37  ;;  %v2093_v27 = vpack.c.bf16 %v1949_v21, %v1941_v11 }
 0x22e   : > { %v2092_v28 = vpack.c.bf16 %v1948_v23, %v1940_v20  ;;  %v1643_v29 = vpop.f32.mrb[72].mxu0  ;;  %v2094_v62 = vpack.c.bf16 %v1950_v26, %v1942_v56  ;;  %v1796_v34 = vpop.f32.mrb[72].mxu1 }
 0x22f   : > { %v1644_v32 = vadd.f32 %v1643_v29, %v4820_v24  ;;  %v1645_v35 = vpop.f32.mrb[73].mxu0  ;;  %v1797_v36 = vadd.f32 %v1796_v34, %v4830_v61  ;;  %v1798_v39 = vpop.f32.mrb[73].mxu1 }
 0x230   : > { %v1646_v38 = vadd.f32 %v1645_v35, %v4826_v31  ;;  %v1647_v41 = vpop.f32.mrb[74].mxu0  ;;  %2992 = vmatprep.mubr.bf16.mxu0 %v2092_v28  ;;  %v1799_v14 = vadd.f32 %v1798_v39, %v4833_v15  ;;  %v1800_v43 = vpop.f32.mrb[74].mxu1  ;;  %3121 = vmatprep.mubr.bf16.mxu1 %v2094_v62 }
 0x231   : > { %v1648_v42 = vadd.f32 %v1647_v41, %v4820_v24  ;;  %v1649_v44 = vpop.f32.mrb[75].mxu0  ;;  %2993 = vmatmul.mubr.bf16.gmra.mrb[164].mxu0 %v2091_v25  ;;  %v1957_v46 = vmax.f32 %v1797_v36, 0.0  ;;  %v1801_v47 = vadd.f32 %v1800_v43, %v4830_v61  ;;  %v1802_v49 = vpop.f32.mrb[75].mxu1  ;;  %3122 = vmatmul.mubr.bf16.gmra.mrb[164].mxu1 %v2093_v27  ;;  %v1955_v16 = vmax.f32 %v1644_v32, 0.0 }
 0x232   : > { %v1650_v48 = vadd.f32 %v1649_v44, %v4826_v31  ;;  %v1958_v50 = vmax.f32 %v1799_v14, 0.0  ;;  %v1803_v52 = vadd.f32 %v1802_v49, %v4833_v15  ;;  %v1956_v53 = vmax.f32 %v1646_v38, 0.0 }
 0x233   : > { %v1963_v51 = vmax.f32 %v1648_v42, 0.0  ;;  %v1965_v17 = vmax.f32 %v1801_v47, 0.0 }
 0x234   : > { %v1964_v54 = vmax.f32 %v1650_v48, 0.0  ;;  %v1966_v6 = vmax.f32 %v1803_v52, 0.0 }
 0x235   : > { %v2099_v55 = vpack.c.bf16 %v1963_v51, %v1955_v16  ;;  %v2101_v13 = vpack.c.bf16 %v1965_v17, %v1957_v46 }
 0x236   : > { %v2100_v58 = vpack.c.bf16 %v1964_v54, %v1956_v53  ;;  %v1653_v59 = vpop.f32.mrb[76].mxu0  ;;  %v2102_v60 = vpack.c.bf16 %v1966_v6, %v1958_v50  ;;  %v1806_v0 = vpop.f32.mrb[76].mxu1 }
 0x237   : > { %v1654_v63 = vadd.f32 %v1653_v59, %v4820_v24  ;;  %v1655_v1 = vpop.f32.mrb[77].mxu0  ;;  %v1807_v22 = vadd.f32 %v1806_v0, %v4830_v61  ;;  %v1808_v2 = vpop.f32.mrb[77].mxu1 }
 0x238   : > { %v1656_v30 = vadd.f32 %v1655_v1, %v4826_v31  ;;  %v1657_v3 = vpop.f32.mrb[78].mxu0  ;;  %3000 = vmatprep.mubr.bf16.mxu0 %v2100_v58  ;;  %v1809_v4 = vadd.f32 %v1808_v2, %v4833_v15  ;;  %v1810_v7 = vpop.f32.mrb[78].mxu1  ;;  %3129 = vmatprep.mubr.bf16.mxu1 %v2102_v60 }
 0x239   : > { %v1658_v5 = vadd.f32 %v1657_v3, %v4820_v24  ;;  %v1659_v8 = vpop.f32.mrb[79].mxu0  ;;  %3001 = vmatmul.mubr.bf16.gmra.mrb[168].mxu0 %v2099_v55  ;;  %v1973_v40 = vmax.f32 %v1807_v22, 0.0  ;;  %v1811_v45 = vadd.f32 %v1810_v7, %v4830_v61  ;;  %v1812_v10 = vpop.f32.mrb[79].mxu1  ;;  %3130 = vmatmul.mubr.bf16.gmra.mrb[168].mxu1 %v2101_v13  ;;  %v1971_v11 = vmax.f32 %v1654_v63, 0.0 }
 0x23a   : > { %v1660_v9 = vadd.f32 %v1659_v8, %v4826_v31  ;;  %v1974_v57 = vmax.f32 %v1809_v4, 0.0  ;;  %v1813_v33 = vadd.f32 %v1812_v10, %v4833_v15  ;;  %v1972_v37 = vmax.f32 %v1656_v30, 0.0 }
 0x23b   : > { %v1979_v12 = vmax.f32 %v1658_v5, 0.0  ;;  %v1981_v56 = vmax.f32 %v1811_v45, 0.0 }
 0x23c   : > { %v1980_v18 = vmax.f32 %v1660_v9, 0.0  ;;  %v1982_v20 = vmax.f32 %v1813_v33, 0.0 }
 0x23d   : > { %v2107_v19 = vpack.c.bf16 %v1979_v12, %v1971_v11  ;;  %v2109_v21 = vpack.c.bf16 %v1981_v56, %v1973_v40 }
 0x23e   : > { %v2108_v23 = vpack.c.bf16 %v1980_v18, %v1972_v37  ;;  %v1663_v25 = vpop.f32.mrb[80].mxu0  ;;  %v2110_v26 = vpack.c.bf16 %v1982_v20, %v1974_v57  ;;  %v1816_v28 = vpop.f32.mrb[80].mxu1 }
 0x23f   : > { %v1664_v27 = vadd.f32 %v1663_v25, %v4820_v24  ;;  %v1665_v29 = vpop.f32.mrb[81].mxu0  ;;  %v1817_v62 = vadd.f32 %v1816_v28, %v4830_v61  ;;  %v1818_v34 = vpop.f32.mrb[81].mxu1 }
 0x240   : > { %v1666_v32 = vadd.f32 %v1665_v29, %v4826_v31  ;;  %v1667_v35 = vpop.f32.mrb[82].mxu0  ;;  %3008 = vmatprep.mubr.bf16.mxu0 %v2108_v23  ;;  %v1819_v36 = vadd.f32 %v1818_v34, %v4833_v15  ;;  %v1820_v39 = vpop.f32.mrb[82].mxu1  ;;  %3137 = vmatprep.mubr.bf16.mxu1 %v2110_v26 }
 0x241   : > { %v1668_v38 = vadd.f32 %v1667_v35, %v4820_v24  ;;  %v1669_v41 = vpop.f32.mrb[83].mxu0  ;;  %3009 = vmatmul.mubr.bf16.gmra.mrb[172].mxu0 %v2107_v19  ;;  %v1989_v14 = vmax.f32 %v1817_v62, 0.0  ;;  %v1821_v42 = vadd.f32 %v1820_v39, %v4830_v61  ;;  %v1822_v44 = vpop.f32.mrb[83].mxu1  ;;  %3138 = vmatmul.mubr.bf16.gmra.mrb[172].mxu1 %v2109_v21  ;;  %v1987_v46 = vmax.f32 %v1664_v27, 0.0 }
 0x242   : > { %v1670_v43 = vadd.f32 %v1669_v41, %v4826_v31  ;;  %v1990_v47 = vmax.f32 %v1819_v36, 0.0  ;;  %v1823_v49 = vadd.f32 %v1822_v44, %v4833_v15  ;;  %v1988_v16 = vmax.f32 %v1666_v32, 0.0 }
 0x243   : > { %v1995_v48 = vmax.f32 %v1668_v38, 0.0  ;;  %v1997_v50 = vmax.f32 %v1821_v42, 0.0 }
 0x244   : > { %v1996_v51 = vmax.f32 %v1670_v43, 0.0  ;;  %v1998_v53 = vmax.f32 %v1823_v49, 0.0 }
 0x245   : > { %v2115_v52 = vpack.c.bf16 %v1995_v48, %v1987_v46  ;;  %v2117_v17 = vpack.c.bf16 %v1997_v50, %v1989_v14 }
 0x246   : > { %v2116_v54 = vpack.c.bf16 %v1996_v51, %v1988_v16  ;;  %v1673_v55 = vpop.f32.mrb[84].mxu0  ;;  %v2118_v6 = vpack.c.bf16 %v1998_v53, %v1990_v47  ;;  %v1826_v58 = vpop.f32.mrb[84].mxu1 }
 0x247   : > { %v1674_v13 = vadd.f32 %v1673_v55, %v4820_v24  ;;  %v1675_v59 = vpop.f32.mrb[85].mxu0  ;;  %v1827_v60 = vadd.f32 %v1826_v58, %v4830_v61  ;;  %v1828_v0 = vpop.f32.mrb[85].mxu1 }
 0x248   : > { %v1676_v63 = vadd.f32 %v1675_v59, %v4826_v31  ;;  %v1677_v1 = vpop.f32.mrb[86].mxu0  ;;  %3016 = vmatprep.mubr.bf16.mxu0 %v2116_v54  ;;  %v1829_v22 = vadd.f32 %v1828_v0, %v4833_v15  ;;  %v1830_v2 = vpop.f32.mrb[86].mxu1  ;;  %3145 = vmatprep.mubr.bf16.mxu1 %v2118_v6 }
 0x249   : > { %v1678_v30 = vadd.f32 %v1677_v1, %v4820_v24  ;;  %v1679_v3 = vpop.f32.mrb[87].mxu0  ;;  %3017 = vmatmul.mubr.bf16.gmra.mrb[176].mxu0 %v2115_v52  ;;  %v2005_v4 = vmax.f32 %v1827_v60, 0.0  ;;  %v1831_v5 = vadd.f32 %v1830_v2, %v4830_v61  ;;  %v1832_v8 = vpop.f32.mrb[87].mxu1  ;;  %3146 = vmatmul.mubr.bf16.gmra.mrb[176].mxu1 %v2117_v17  ;;  %v2003_v40 = vmax.f32 %v1674_v13, 0.0 }
 0x24a   : > { %v1680_v7 = vadd.f32 %v1679_v3, %v4826_v31  ;;  %v2006_v45 = vmax.f32 %v1829_v22, 0.0  ;;  %v1833_v10 = vadd.f32 %v1832_v8, %v4833_v15  ;;  %v2004_v11 = vmax.f32 %v1676_v63, 0.0 }
 0x24b   : > { %v2011_v9 = vmax.f32 %v1678_v30, 0.0  ;;  %v2013_v57 = vmax.f32 %v1831_v5, 0.0 }
 0x24c   : > { %v2012_v12 = vmax.f32 %v1680_v7, 0.0  ;;  %v2014_v37 = vmax.f32 %v1833_v10, 0.0 }
 0x24d   : > { %v2123_v33 = vpack.c.bf16 %v2011_v9, %v2003_v40  ;;  %v2125_v56 = vpack.c.bf16 %v2013_v57, %v2005_v4 }
 0x24e   : > { %v2124_v18 = vpack.c.bf16 %v2012_v12, %v2004_v11  ;;  %v1683_v19 = vpop.f32.mrb[88].mxu0  ;;  %v2126_v20 = vpack.c.bf16 %v2014_v37, %v2006_v45  ;;  %v1836_v23 = vpop.f32.mrb[88].mxu1 }
 0x24f   : > { %v1684_v21 = vadd.f32 %v1683_v19, %v4820_v24  ;;  %v1685_v25 = vpop.f32.mrb[89].mxu0  ;;  %v1837_v26 = vadd.f32 %v1836_v23, %v4830_v61  ;;  %v1838_v28 = vpop.f32.mrb[89].mxu1 }
 0x250   : > { %v1686_v27 = vadd.f32 %v1685_v25, %v4826_v31  ;;  %v1687_v29 = vpop.f32.mrb[90].mxu0  ;;  %3024 = vmatprep.mubr.bf16.mxu0 %v2124_v18  ;;  %v1839_v62 = vadd.f32 %v1838_v28, %v4833_v15  ;;  %v1840_v34 = vpop.f32.mrb[90].mxu1  ;;  %3153 = vmatprep.mubr.bf16.mxu1 %v2126_v20 }
 0x251   : > { %v1688_v32 = vadd.f32 %v1687_v29, %v4820_v24  ;;  %v1689_v35 = vpop.f32.mrb[91].mxu0  ;;  %3025 = vmatmul.mubr.bf16.gmra.mrb[180].mxu0 %v2123_v33  ;;  %v2021_v36 = vmax.f32 %v1837_v26, 0.0  ;;  %v1841_v38 = vadd.f32 %v1840_v34, %v4830_v61  ;;  %v1842_v41 = vpop.f32.mrb[91].mxu1  ;;  %3154 = vmatmul.mubr.bf16.gmra.mrb[180].mxu1 %v2125_v56  ;;  %v2019_v14 = vmax.f32 %v1684_v21, 0.0  ;;  %v4934_v33 = vld [vmem:[%s5115_s4] ss:$0 sm:$0xff] }
 0x252   : > { %v1690_v39 = vadd.f32 %v1689_v35, %v4826_v31  ;;  %v2022_v42 = vmax.f32 %v1839_v62, 0.0  ;;  %v1843_v44 = vadd.f32 %v1842_v41, %v4833_v15  ;;  %v2020_v46 = vmax.f32 %v1686_v27, 0.0 }
 0x253   : > { %v2027_v43 = vmax.f32 %v1688_v32, 0.0  ;;  %v2029_v47 = vmax.f32 %v1841_v38, 0.0 }
 0x254   : > { %v2028_v48 = vmax.f32 %v1690_v39, 0.0  ;;  %v2030_v16 = vmax.f32 %v1843_v44, 0.0 }
 0x255   : > { %v2131_v49 = vpack.c.bf16 %v2027_v43, %v2019_v14  ;;  %v2133_v50 = vpack.c.bf16 %v2029_v47, %v2021_v36 }
 0x256   : > { %v2132_v51 = vpack.c.bf16 %v2028_v48, %v2020_v46  ;;  %v1693_v52 = vpop.f32.mrb[92].mxu0  ;;  %v2134_v53 = vpack.c.bf16 %v2030_v16, %v2022_v42  ;;  %v1846_v54 = vpop.f32.mrb[92].mxu1 }
 0x257   : > { %v1694_v17 = vadd.f32 %v1693_v52, %v4820_v24  ;;  %v1695_v55 = vpop.f32.mrb[93].mxu0  ;;  %v1847_v6 = vadd.f32 %v1846_v54, %v4830_v61  ;;  %v1848_v58 = vpop.f32.mrb[93].mxu1 }
 0x258   : > { %v1696_v13 = vadd.f32 %v1695_v55, %v4826_v31  ;;  %v1697_v59 = vpop.f32.mrb[94].mxu0  ;;  %3032 = vmatprep.mubr.bf16.mxu0 %v2132_v51  ;;  %v1849_v60 = vadd.f32 %v1848_v58, %v4833_v15  ;;  %v1850_v0 = vpop.f32.mrb[94].mxu1  ;;  %3161 = vmatprep.mubr.bf16.mxu1 %v2134_v53 }
 0x259   : > { %v1698_v63 = vadd.f32 %v1697_v59, %v4820_v24  ;;  %v1699_v1 = vpop.f32.mrb[95].mxu0  ;;  %3033 = vmatmul.mubr.bf16.gmra.mrb[184].mxu0 %v2131_v49  ;;  %v2037_v22 = vmax.f32 %v1847_v6, 0.0  ;;  %v1851_v30 = vadd.f32 %v1850_v0, %v4830_v61  ;;  %v1852_v3 = vpop.f32.mrb[95].mxu1  ;;  %3162 = vmatmul.mubr.bf16.gmra.mrb[184].mxu1 %v2133_v50  ;;  %v2035_v4 = vmax.f32 %v1694_v17, 0.0 }
 0x25a   : > { %v1700_v2 = vadd.f32 %v1699_v1, %v4826_v31  ;;  %v2038_v5 = vmax.f32 %v1849_v60, 0.0  ;;  %v1853_v8 = vadd.f32 %v1852_v3, %v4833_v15  ;;  %v2036_v40 = vmax.f32 %v1696_v13, 0.0 }
 0x25b   : > { %v2043_v7 = vmax.f32 %v1698_v63, 0.0  ;;  %v2045_v45 = vmax.f32 %v1851_v30, 0.0 }
 0x25c   : > { %v2044_v9 = vmax.f32 %v1700_v2, 0.0  ;;  %v2046_v10 = vmax.f32 %v1853_v8, 0.0 }
 0x25d   : > { %v2139_v24 = vpack.c.bf16 %v2043_v7, %v2035_v4  ;;  %v2141_v11 = vpack.c.bf16 %v2045_v45, %v2037_v22 }
 0x25e   : > { %v2140_v57 = vpack.c.bf16 %v2044_v9, %v2036_v40  ;;  %v2142_v12 = vpack.c.bf16 %v2046_v10, %v2038_v5 }
 0x260   : > { %3040 = vmatprep.mubr.bf16.mxu0 %v2140_v57  ;;  %3169 = vmatprep.mubr.bf16.mxu1 %v2142_v12 }
 0x261   : > { %3041 = vmatmul.mubr.bf16.gmra.mrb[188].mxu0 %v2139_v24  ;;  %3170 = vmatmul.mubr.bf16.gmra.mrb[188].mxu1 %v2141_v11 }
 0x27c   : > { %v3570_v31 = vpop.f32.mrb[96].mxu0  ;;  %v3658_v61 = vpop.f32.mrb[96].mxu1 }
 0x27d   : > { %v3571_v15 = vpop.f32.mrb[97].mxu0  ;;  %v3659_v56 = vpop.f32.mrb[97].mxu1 }
 0x27e   : > { %v3572_v37 = vadd.f32 %v3571_v15, %v3570_v31  ;;  %v3573_v18 = vpop.f32.mrb[98].mxu0  ;;  %v3660_v19 = vadd.f32 %v3659_v56, %v3658_v61  ;;  %v3661_v20 = vpop.f32.mrb[98].mxu1 }
 0x27f   : > { %v3574_v21 = vpop.f32.mrb[99].mxu0  ;;  %v3662_v26 = vpop.f32.mrb[99].mxu1 }
 0x280   : > { %v2697_v23 = vadd.f32 %v3572_v37, %v4934_v33  ;;  %v3575_v25 = vadd.f32 %v3574_v21, %v3573_v18  ;;  %v3663_v27 = vadd.f32 %v3662_v26, %v3661_v20 }
 0x282   : > { %v4937_v28 = vadd.f32 %v3660_v19, %v2697_v23  ;;  %v2700_v29 = vadd.f32 %v3575_v25, %v4934_v33 }
 0x284   : > { %v4940_v62 = vadd.f32 %v3663_v27, %v2700_v29  ;;  %v3576_v32 = vpop.f32.mrb[100].mxu0  ;;  %v3664_v34 = vpop.f32.mrb[100].mxu1 }
 0x285   : > { %v3577_v35 = vpop.f32.mrb[101].mxu0  ;;  %v3665_v38 = vpop.f32.mrb[101].mxu1 }
 0x286   : > { %v3578_v36 = vadd.f32 %v3577_v35, %v3576_v32  ;;  %v3579_v39 = vpop.f32.mrb[102].mxu0  ;;  %v3666_v41 = vadd.f32 %v3665_v38, %v3664_v34  ;;  %v3667_v14 = vpop.f32.mrb[102].mxu1 }
 0x287   : > { %v3580_v42 = vpop.f32.mrb[103].mxu0  ;;  %v3668_v46 = vpop.f32.mrb[103].mxu1 }
 0x288   : > { %v2705_v43 = vadd.f32 %v3578_v36, %v4934_v33  ;;  %v3581_v44 = vadd.f32 %v3580_v42, %v3579_v39  ;;  %v3669_v47 = vadd.f32 %v3668_v46, %v3667_v14 }
 0x28a   : > { %v4943_v48 = vadd.f32 %v3666_v41, %v2705_v43  ;;  %v2708_v49 = vadd.f32 %v3581_v44, %v4934_v33 }
 0x28c   : > { %v4946_v16 = vadd.f32 %v3669_v47, %v2708_v49  ;;  %v3582_v50 = vpop.f32.mrb[104].mxu0  ;;  %v3670_v51 = vpop.f32.mrb[104].mxu1 }
 0x28d   : > { %v3583_v52 = vpop.f32.mrb[105].mxu0  ;;  %v3671_v17 = vpop.f32.mrb[105].mxu1 }
 0x28e   : > { %v3584_v53 = vadd.f32 %v3583_v52, %v3582_v50  ;;  %v3585_v54 = vpop.f32.mrb[106].mxu0  ;;  %v3672_v55 = vadd.f32 %v3671_v17, %v3670_v51  ;;  %v3673_v6 = vpop.f32.mrb[106].mxu1 }
 0x28f   : > { %v3586_v13 = vpop.f32.mrb[107].mxu0  ;;  %v3674_v60 = vpop.f32.mrb[107].mxu1 }
 0x290   : > { %v2713_v58 = vadd.f32 %v3584_v53, %v4934_v33  ;;  %v3587_v59 = vadd.f32 %v3586_v13, %v3585_v54  ;;  %v3675_v63 = vadd.f32 %v3674_v60, %v3673_v6 }
 0x292   : > { %v4949_v0 = vadd.f32 %v3672_v55, %v2713_v58  ;;  %v2716_v1 = vadd.f32 %v3587_v59, %v4934_v33 }
 0x294   : > { %v4952_v22 = vadd.f32 %v3675_v63, %v2716_v1  ;;  %v3588_v30 = vpop.f32.mrb[108].mxu0  ;;  %v3676_v2 = vpop.f32.mrb[108].mxu1 }
 0x295   : > { %v3589_v3 = vpop.f32.mrb[109].mxu0  ;;  %v3677_v5 = vpop.f32.mrb[109].mxu1 }
 0x296   : > { %v3590_v4 = vadd.f32 %v3589_v3, %v3588_v30  ;;  %v3591_v7 = vpop.f32.mrb[110].mxu0  ;;  %v3678_v8 = vadd.f32 %v3677_v5, %v3676_v2  ;;  %v3679_v40 = vpop.f32.mrb[110].mxu1 }
 0x297   : > { %v3592_v45 = vpop.f32.mrb[111].mxu0  ;;  %v3680_v10 = vpop.f32.mrb[111].mxu1 }
 0x298   : > { %v2721_v9 = vadd.f32 %v3590_v4, %v4934_v33  ;;  %v3593_v24 = vadd.f32 %v3592_v45, %v3591_v7  ;;  %v3681_v11 = vadd.f32 %v3680_v10, %v3679_v40 }
 0x29a   : > { %v4955_v57 = vadd.f32 %v3678_v8, %v2721_v9  ;;  %v2724_v12 = vadd.f32 %v3593_v24, %v4934_v33 }
 0x29c   : > { %v4958_v31 = vadd.f32 %v3681_v11, %v2724_v12  ;;  %v3594_v61 = vpop.f32.mrb[112].mxu0  ;;  %v3682_v15 = vpop.f32.mrb[112].mxu1 }
 0x29d   : > { %v3595_v37 = vpop.f32.mrb[113].mxu0  ;;  %v3683_v18 = vpop.f32.mrb[113].mxu1 }
 0x29e   : > { %v3596_v56 = vadd.f32 %v3595_v37, %v3594_v61  ;;  %v3597_v19 = vpop.f32.mrb[114].mxu0  ;;  %v3684_v20 = vadd.f32 %v3683_v18, %v3682_v15  ;;  %v3685_v21 = vpop.f32.mrb[114].mxu1 }
 0x29f   : > { %v3598_v23 = vpop.f32.mrb[115].mxu0  ;;  %v3686_v27 = vpop.f32.mrb[115].mxu1 }
 0x2a0   : > { %v2729_v25 = vadd.f32 %v3596_v56, %v4934_v33  ;;  %v3599_v26 = vadd.f32 %v3598_v23, %v3597_v19  ;;  %v3687_v29 = vadd.f32 %v3686_v27, %v3685_v21 }
 0x2a2   : > { %v4961_v32 = vadd.f32 %v3684_v20, %v2729_v25  ;;  %v2732_v34 = vadd.f32 %v3599_v26, %v4934_v33 }
 0x2a4   : > { %v4964_v35 = vadd.f32 %v3687_v29, %v2732_v34  ;;  %v3600_v36 = vpop.f32.mrb[116].mxu0  ;;  %v3688_v38 = vpop.f32.mrb[116].mxu1 }
 0x2a5   : > { %v3601_v39 = vpop.f32.mrb[117].mxu0  ;;  %v3689_v14 = vpop.f32.mrb[117].mxu1 }
 0x2a6   : > { %v3602_v41 = vadd.f32 %v3601_v39, %v3600_v36  ;;  %v3603_v42 = vpop.f32.mrb[118].mxu0  ;;  %v3690_v43 = vadd.f32 %v3689_v14, %v3688_v38  ;;  %v3691_v44 = vpop.f32.mrb[118].mxu1 }
 0x2a7   : > { %v3604_v46 = vpop.f32.mrb[119].mxu0  ;;  %v3692_v50 = vpop.f32.mrb[119].mxu1 }
 0x2a8   : > { %v2737_v47 = vadd.f32 %v3602_v41, %v4934_v33  ;;  %v3605_v49 = vadd.f32 %v3604_v46, %v3603_v42  ;;  %v3693_v51 = vadd.f32 %v3692_v50, %v3691_v44 }
 0x2aa   : > { %v4967_v52 = vadd.f32 %v3690_v43, %v2737_v47  ;;  %v2740_v53 = vadd.f32 %v3605_v49, %v4934_v33 }
 0x2ac   : > { %v4970_v17 = vadd.f32 %v3693_v51, %v2740_v53  ;;  %v3606_v54 = vpop.f32.mrb[120].mxu0  ;;  %v3694_v55 = vpop.f32.mrb[120].mxu1 }
 0x2ad   : > { %v3607_v6 = vpop.f32.mrb[121].mxu0  ;;  %v3695_v58 = vpop.f32.mrb[121].mxu1 }
 0x2ae   : > { %v3608_v13 = vadd.f32 %v3607_v6, %v3606_v54  ;;  %v3609_v59 = vpop.f32.mrb[122].mxu0  ;;  %v3696_v60 = vadd.f32 %v3695_v58, %v3694_v55  ;;  %v3697_v63 = vpop.f32.mrb[122].mxu1 }
 0x2af   : > { %v3610_v1 = vpop.f32.mrb[123].mxu0  ;;  %v3698_v3 = vpop.f32.mrb[123].mxu1 }
 0x2b0   : > { %v2745_v30 = vadd.f32 %v3608_v13, %v4934_v33  ;;  %v3611_v2 = vadd.f32 %v3610_v1, %v3609_v59  ;;  %v3699_v4 = vadd.f32 %v3698_v3, %v3697_v63 }
 0x2b2   : > { %v4973_v5 = vadd.f32 %v3696_v60, %v2745_v30  ;;  %v2748_v7 = vadd.f32 %v3611_v2, %v4934_v33 }
 0x2b4   : > { %v4976_v8 = vadd.f32 %v3699_v4, %v2748_v7  ;;  %v3612_v40 = vpop.f32.mrb[124].mxu0  ;;  %v3700_v45 = vpop.f32.mrb[124].mxu1 }
 0x2b5   : > { %v3613_v9 = vpop.f32.mrb[125].mxu0  ;;  %v3701_v10 = vpop.f32.mrb[125].mxu1 }
 0x2b6   : > { %v3614_v24 = vadd.f32 %v3613_v9, %v3612_v40  ;;  %v3615_v11 = vpop.f32.mrb[126].mxu0  ;;  %v3702_v12 = vadd.f32 %v3701_v10, %v3700_v45  ;;  %v3703_v61 = vpop.f32.mrb[126].mxu1 }
 0x2b7   : > { %v3616_v15 = vpop.f32.mrb[127].mxu0  ;;  %v3704_v18 = vpop.f32.mrb[127].mxu1 }
 0x2b8   : > { %v2753_v37 = vadd.f32 %v3614_v24, %v4934_v33  ;;  %v3617_v56 = vadd.f32 %v3616_v15, %v3615_v11  ;;  %v3705_v19 = vadd.f32 %v3704_v18, %v3703_v61 }
 0x2ba   : > { %v4979_v20 = vadd.f32 %v3702_v12, %v2753_v37  ;;  %v2756_v21 = vadd.f32 %v3617_v56, %v4934_v33 }
 0x2bc   : > { %v4982_v23 = vadd.f32 %v3705_v19, %v2756_v21  ;;  %v3618_v25 = vpop.f32.mrb[128].mxu0  ;;  %v3706_v26 = vpop.f32.mrb[128].mxu1 }
 0x2bd   : > { %v3619_v27 = vpop.f32.mrb[129].mxu0  ;;  %v3707_v34 = vpop.f32.mrb[129].mxu1 }
 0x2be   : > { %v3620_v29 = vadd.f32 %v3619_v27, %v3618_v25  ;;  %v3621_v36 = vpop.f32.mrb[130].mxu0  ;;  %v3708_v38 = vadd.f32 %v3707_v34, %v3706_v26  ;;  %v3709_v39 = vpop.f32.mrb[130].mxu1 }
 0x2bf   : > { %v3622_v41 = vpop.f32.mrb[131].mxu0  ;;  %v3710_v43 = vpop.f32.mrb[131].mxu1 }
 0x2c0   : > { %v2761_v14 = vadd.f32 %v3620_v29, %v4934_v33  ;;  %v3623_v42 = vadd.f32 %v3622_v41, %v3621_v36  ;;  %v3711_v44 = vadd.f32 %v3710_v43, %v3709_v39 }
 0x2c2   : > { %v4985_v46 = vadd.f32 %v3708_v38, %v2761_v14  ;;  %v2764_v47 = vadd.f32 %v3623_v42, %v4934_v33 }
 0x2c4   : > { %v4988_v49 = vadd.f32 %v3711_v44, %v2764_v47  ;;  %v3624_v50 = vpop.f32.mrb[132].mxu0  ;;  %v3712_v51 = vpop.f32.mrb[132].mxu1 }
 0x2c5   : > { %v3625_v53 = vpop.f32.mrb[133].mxu0  ;;  %v3713_v55 = vpop.f32.mrb[133].mxu1 }
 0x2c6   : > { %v3626_v54 = vadd.f32 %v3625_v53, %v3624_v50  ;;  %v3627_v6 = vpop.f32.mrb[134].mxu0  ;;  %v3714_v13 = vadd.f32 %v3713_v55, %v3712_v51  ;;  %v3715_v58 = vpop.f32.mrb[134].mxu1 }
 0x2c7   : > { %v3628_v59 = vpop.f32.mrb[135].mxu0  ;;  %v3716_v1 = vpop.f32.mrb[135].mxu1 }
 0x2c8   : > { %v2769_v60 = vadd.f32 %v3626_v54, %v4934_v33  ;;  %v3629_v63 = vadd.f32 %v3628_v59, %v3627_v6  ;;  %v3717_v30 = vadd.f32 %v3716_v1, %v3715_v58 }
 0x2ca   : > { %v4991_v2 = vadd.f32 %v3714_v13, %v2769_v60  ;;  %v2772_v3 = vadd.f32 %v3629_v63, %v4934_v33 }
 0x2cc   : > { %v4994_v4 = vadd.f32 %v3717_v30, %v2772_v3  ;;  %v3630_v7 = vpop.f32.mrb[136].mxu0  ;;  %v3718_v40 = vpop.f32.mrb[136].mxu1 }
 0x2cd   : > { %v3631_v45 = vpop.f32.mrb[137].mxu0  ;;  %v3719_v24 = vpop.f32.mrb[137].mxu1 }
 0x2ce   : > { %v3632_v9 = vadd.f32 %v3631_v45, %v3630_v7  ;;  %v3633_v10 = vpop.f32.mrb[138].mxu0  ;;  %v3720_v11 = vadd.f32 %v3719_v24, %v3718_v40  ;;  %v3721_v12 = vpop.f32.mrb[138].mxu1 }
 0x2cf   : > { %v3634_v61 = vpop.f32.mrb[139].mxu0  ;;  %v3722_v56 = vpop.f32.mrb[139].mxu1 }
 0x2d0   : > { %v2777_v15 = vadd.f32 %v3632_v9, %v4934_v33  ;;  %v3635_v37 = vadd.f32 %v3634_v61, %v3633_v10  ;;  %v3723_v18 = vadd.f32 %v3722_v56, %v3721_v12 }
 0x2d2   : > { %v4997_v19 = vadd.f32 %v3720_v11, %v2777_v15  ;;  %v2780_v21 = vadd.f32 %v3635_v37, %v4934_v33 }
 0x2d4   : > { %v5000_v25 = vadd.f32 %v3723_v18, %v2780_v21  ;;  %v3636_v26 = vpop.f32.mrb[140].mxu0  ;;  %v3724_v27 = vpop.f32.mrb[140].mxu1 }
 0x2d5   : > { %v3637_v29 = vpop.f32.mrb[141].mxu0  ;;  %v3725_v36 = vpop.f32.mrb[141].mxu1 }
 0x2d6   : > { %v3638_v34 = vadd.f32 %v3637_v29, %v3636_v26  ;;  %v3639_v38 = vpop.f32.mrb[142].mxu0  ;;  %v3726_v39 = vadd.f32 %v3725_v36, %v3724_v27  ;;  %v3727_v41 = vpop.f32.mrb[142].mxu1 }
 0x2d7   : > { %v3640_v14 = vpop.f32.mrb[143].mxu0  ;;  %v3728_v44 = vpop.f32.mrb[143].mxu1 }
 0x2d8   : > { %v2785_v42 = vadd.f32 %v3638_v34, %v4934_v33  ;;  %v3641_v43 = vadd.f32 %v3640_v14, %v3639_v38  ;;  %v3729_v47 = vadd.f32 %v3728_v44, %v3727_v41 }
 0x2da   : > { %v5003_v50 = vadd.f32 %v3726_v39, %v2785_v42  ;;  %v2788_v51 = vadd.f32 %v3641_v43, %v4934_v33 }
 0x2dc   : > { %v5006_v53 = vadd.f32 %v3729_v47, %v2788_v51  ;;  %v3746_v54 = vpop.f32.mrb[144].mxu0  ;;  %v3834_v55 = vpop.f32.mrb[144].mxu1 }
 0x2dd   : > { %v3747_v6 = vpop.f32.mrb[145].mxu0  ;;  %v3835_v58 = vpop.f32.mrb[145].mxu1 }
 0x2de   : > { %v3748_v13 = vadd.f32 %v3747_v6, %v3746_v54  ;;  %v3749_v59 = vpop.f32.mrb[146].mxu0  ;;  %v3836_v60 = vadd.f32 %v3835_v58, %v3834_v55  ;;  %v3837_v63 = vpop.f32.mrb[146].mxu1 }
 0x2df   : > { %v3750_v1 = vpop.f32.mrb[147].mxu0  ;;  %v3838_v7 = vpop.f32.mrb[147].mxu1 }
 0x2e0   : > { %v2955_v30 = vadd.f32 %v3748_v13, %v4937_v28  ;;  %v3751_v3 = vadd.f32 %v3750_v1, %v3749_v59  ;;  %v3839_v40 = vadd.f32 %v3838_v7, %v3837_v63 }
 0x2e2   : > { %v3084_v45 = vadd.f32 %v3836_v60, %v2955_v30  ;;  %v2958_v33 = vadd.f32 %v3751_v3, %v4940_v62 }
 0x2e4   : > { %3178 = vst [vmem:[%s5012_s11] sm:$0xff] %v3084_v45  ;;  %v3087_v9 = vadd.f32 %v3839_v40, %v2958_v33  ;;  %v3752_v24 = vpop.f32.mrb[148].mxu0  ;;  %v3840_v10 = vpop.f32.mrb[148].mxu1 }
 0x2e5   : > { %v3753_v11 = vpop.f32.mrb[149].mxu0  ;;  %v3841_v28 = vpop.f32.mrb[149].mxu1 }
 0x2e6   : > { %3179 = vst [vmem:[%s5012_s11 + $0x8] sm:$0xff] %v3087_v9  ;;  %v3754_v12 = vadd.f32 %v3753_v11, %v3752_v24  ;;  %v3755_v61 = vpop.f32.mrb[150].mxu0  ;;  %v3842_v15 = vadd.f32 %v3841_v28, %v3840_v10  ;;  %v3843_v37 = vpop.f32.mrb[150].mxu1 }
 0x2e7   : > { %v3756_v56 = vpop.f32.mrb[151].mxu0  ;;  %v3844_v21 = vpop.f32.mrb[151].mxu1 }
 0x2e8   : > { %v2963_v62 = vadd.f32 %v3754_v12, %v4943_v48  ;;  %v3757_v18 = vadd.f32 %v3756_v56, %v3755_v61  ;;  %v3845_v26 = vadd.f32 %v3844_v21, %v3843_v37 }
 0x2ea   : > { %v3092_v27 = vadd.f32 %v3842_v15, %v2963_v62  ;;  %v2966_v29 = vadd.f32 %v3757_v18, %v4946_v16 }
 0x2ec   : > { %3180 = vst [vmem:[%s5012_s11 + $0x10] sm:$0xff] %v3092_v27  ;;  %v3095_v34 = vadd.f32 %v3845_v26, %v2966_v29  ;;  %v3758_v36 = vpop.f32.mrb[152].mxu0  ;;  %v3846_v38 = vpop.f32.mrb[152].mxu1 }
 0x2ed   : > { %v3759_v39 = vpop.f32.mrb[153].mxu0  ;;  %v3847_v14 = vpop.f32.mrb[153].mxu1 }
 0x2ee   : > { %3181 = vst [vmem:[%s5012_s11 + $0x18] sm:$0xff] %v3095_v34  ;;  %v3760_v41 = vadd.f32 %v3759_v39, %v3758_v36  ;;  %v3761_v42 = vpop.f32.mrb[154].mxu0  ;;  %v3848_v43 = vadd.f32 %v3847_v14, %v3846_v38  ;;  %v3849_v44 = vpop.f32.mrb[154].mxu1 }
 0x2ef   : > { %v3762_v48 = vpop.f32.mrb[155].mxu0  ;;  %v3850_v54 = vpop.f32.mrb[155].mxu1 }
 0x2f0   : > { %v2971_v47 = vadd.f32 %v3760_v41, %v4949_v0  ;;  %v3763_v51 = vadd.f32 %v3762_v48, %v3761_v42  ;;  %v3851_v55 = vadd.f32 %v3850_v54, %v3849_v44 }
 0x2f2   : > { %v3100_v16 = vadd.f32 %v3848_v43, %v2971_v47  ;;  %v2974_v6 = vadd.f32 %v3763_v51, %v4952_v22 }
 0x2f4   : > { %3182 = vst [vmem:[%s5012_s11 + $0x20] sm:$0xff] %v3100_v16  ;;  %v3103_v13 = vadd.f32 %v3851_v55, %v2974_v6  ;;  %v3764_v58 = vpop.f32.mrb[156].mxu0  ;;  %v3852_v59 = vpop.f32.mrb[156].mxu1 }
 0x2f5   : > { %v3765_v60 = vpop.f32.mrb[157].mxu0  ;;  %v3853_v1 = vpop.f32.mrb[157].mxu1 }
 0x2f6   : > { %3183 = vst [vmem:[%s5012_s11 + $0x28] sm:$0xff] %v3103_v13  ;;  %v3766_v63 = vadd.f32 %v3765_v60, %v3764_v58  ;;  %v3767_v30 = vpop.f32.mrb[158].mxu0  ;;  %v3854_v3 = vadd.f32 %v3853_v1, %v3852_v59  ;;  %v3855_v7 = vpop.f32.mrb[158].mxu1 }
 0x2f7   : > { %v3768_v0 = vpop.f32.mrb[159].mxu0  ;;  %v3856_v33 = vpop.f32.mrb[159].mxu1 }
 0x2f8   : > { %v2979_v40 = vadd.f32 %v3766_v63, %v4955_v57  ;;  %v3769_v45 = vadd.f32 %v3768_v0, %v3767_v30  ;;  %v3857_v9 = vadd.f32 %v3856_v33, %v3855_v7 }
 0x2fa   : > { %v3108_v22 = vadd.f32 %v3854_v3, %v2979_v40  ;;  %v2982_v24 = vadd.f32 %v3769_v45, %v4958_v31 }
 0x2fc   : > { %3184 = vst [vmem:[%s5012_s11 + $0x30] sm:$0xff] %v3108_v22  ;;  %v3111_v10 = vadd.f32 %v3857_v9, %v2982_v24  ;;  %v3770_v11 = vpop.f32.mrb[160].mxu0  ;;  %v3858_v12 = vpop.f32.mrb[160].mxu1 }
 0x2fd   : > { %v3771_v28 = vpop.f32.mrb[161].mxu0  ;;  %v3859_v15 = vpop.f32.mrb[161].mxu1 }
 0x2fe   : > { %3185 = vst [vmem:[%s5012_s11 + $0x38] sm:$0xff] %v3111_v10  ;;  %v3772_v61 = vadd.f32 %v3771_v28, %v3770_v11  ;;  %v3773_v37 = vpop.f32.mrb[162].mxu0  ;;  %v3860_v56 = vadd.f32 %v3859_v15, %v3858_v12  ;;  %v3861_v62 = vpop.f32.mrb[162].mxu1 }
 0x2ff   : > { %v3774_v57 = vpop.f32.mrb[163].mxu0  ;;  %v3862_v26 = vpop.f32.mrb[163].mxu1 }
 0x300   : > { %v2987_v18 = vadd.f32 %v3772_v61, %v4961_v32  ;;  %v3775_v21 = vadd.f32 %v3774_v57, %v3773_v37  ;;  %v3863_v27 = vadd.f32 %v3862_v26, %v3861_v62 }
 0x302   : > { %v3116_v31 = vadd.f32 %v3860_v56, %v2987_v18  ;;  %v2990_v29 = vadd.f32 %v3775_v21, %v4964_v35 }
 0x304   : > { %3186 = vst [vmem:[%s5012_s11 + $0x40] sm:$0xff] %v3116_v31  ;;  %v3119_v34 = vadd.f32 %v3863_v27, %v2990_v29  ;;  %v3776_v36 = vpop.f32.mrb[164].mxu0  ;;  %v3864_v38 = vpop.f32.mrb[164].mxu1 }
 0x305   : > { %v3777_v39 = vpop.f32.mrb[165].mxu0  ;;  %v3865_v14 = vpop.f32.mrb[165].mxu1 }
 0x306   : > { %3187 = vst [vmem:[%s5012_s11 + $0x48] sm:$0xff] %v3119_v34  ;;  %v3778_v41 = vadd.f32 %v3777_v39, %v3776_v36  ;;  %v3779_v42 = vpop.f32.mrb[166].mxu0  ;;  %v3866_v43 = vadd.f32 %v3865_v14, %v3864_v38  ;;  %v3867_v44 = vpop.f32.mrb[166].mxu1 }
 0x307   : > { %v3780_v32 = vpop.f32.mrb[167].mxu0  ;;  %v3868_v51 = vpop.f32.mrb[167].mxu1 }
 0x308   : > { %v2995_v48 = vadd.f32 %v3778_v41, %v4967_v52  ;;  %v3781_v47 = vadd.f32 %v3780_v32, %v3779_v42  ;;  %v3869_v54 = vadd.f32 %v3868_v51, %v3867_v44 }
 0x30a   : > { %v3124_v35 = vadd.f32 %v3866_v43, %v2995_v48  ;;  %v2998_v55 = vadd.f32 %v3781_v47, %v4970_v17 }
 0x30c   : > { %3188 = vst [vmem:[%s5012_s11 + $0x50] sm:$0xff] %v3124_v35  ;;  %v3127_v16 = vadd.f32 %v3869_v54, %v2998_v55  ;;  %v3782_v6 = vpop.f32.mrb[168].mxu0  ;;  %v3870_v13 = vpop.f32.mrb[168].mxu1 }
 0x30d   : > { %v3783_v58 = vpop.f32.mrb[169].mxu0  ;;  %v3871_v60 = vpop.f32.mrb[169].mxu1 }
 0x30e   : > { %3189 = vst [vmem:[%s5012_s11 + $0x58] sm:$0xff] %v3127_v16  ;;  %v3784_v59 = vadd.f32 %v3783_v58, %v3782_v6  ;;  %v3785_v63 = vpop.f32.mrb[170].mxu0  ;;  %v3872_v1 = vadd.f32 %v3871_v60, %v3870_v13  ;;  %v3873_v30 = vpop.f32.mrb[170].mxu1 }
 0x30f   : > { %v3786_v52 = vpop.f32.mrb[171].mxu0  ;;  %v3874_v0 = vpop.f32.mrb[171].mxu1 }
 0x310   : > { %v3003_v3 = vadd.f32 %v3784_v59, %v4973_v5  ;;  %v3787_v7 = vadd.f32 %v3786_v52, %v3785_v63  ;;  %v3875_v40 = vadd.f32 %v3874_v0, %v3873_v30 }
 0x312   : > { %v3132_v17 = vadd.f32 %v3872_v1, %v3003_v3  ;;  %v3006_v45 = vadd.f32 %v3787_v7, %v4976_v8 }
 0x314   : > { %3190 = vst [vmem:[%s5012_s11 + $0x60] sm:$0xff] %v3132_v17  ;;  %v3135_v33 = vadd.f32 %v3875_v40, %v3006_v45  ;;  %v3788_v9 = vpop.f32.mrb[172].mxu0  ;;  %v3876_v22 = vpop.f32.mrb[172].mxu1 }
 0x315   : > { %v3789_v24 = vpop.f32.mrb[173].mxu0  ;;  %v3877_v11 = vpop.f32.mrb[173].mxu1 }
 0x316   : > { %3191 = vst [vmem:[%s5012_s11 + $0x68] sm:$0xff] %v3135_v33  ;;  %v3790_v10 = vadd.f32 %v3789_v24, %v3788_v9  ;;  %v3791_v12 = vpop.f32.mrb[174].mxu0  ;;  %v3878_v28 = vadd.f32 %v3877_v11, %v3876_v22  ;;  %v3879_v61 = vpop.f32.mrb[174].mxu1 }
 0x317   : > { %v3792_v5 = vpop.f32.mrb[175].mxu0  ;;  %v3880_v56 = vpop.f32.mrb[175].mxu1 }
 0x318   : > { %v3011_v15 = vadd.f32 %v3790_v10, %v4979_v20  ;;  %v3793_v37 = vadd.f32 %v3792_v5, %v3791_v12  ;;  %v3881_v62 = vadd.f32 %v3880_v56, %v3879_v61 }
 0x31a   : > { %v3140_v8 = vadd.f32 %v3878_v28, %v3011_v15  ;;  %v3014_v57 = vadd.f32 %v3793_v37, %v4982_v23 }
 0x31c   : > { %3192 = vst [vmem:[%s5012_s11 + $0x70] sm:$0xff] %v3140_v8  ;;  %v3143_v18 = vadd.f32 %v3881_v62, %v3014_v57  ;;  %v3794_v21 = vpop.f32.mrb[176].mxu0  ;;  %v3882_v26 = vpop.f32.mrb[176].mxu1 }
 0x31d   : > { %v3795_v27 = vpop.f32.mrb[177].mxu0  ;;  %v3883_v29 = vpop.f32.mrb[177].mxu1 }
 0x31e   : > { %3193 = vst [vmem:[%s5012_s11 + $0x78] sm:$0xff] %v3143_v18  ;;  %v3796_v31 = vadd.f32 %v3795_v27, %v3794_v21  ;;  %v3797_v34 = vpop.f32.mrb[178].mxu0  ;;  %v3884_v36 = vadd.f32 %v3883_v29, %v3882_v26  ;;  %v3885_v38 = vpop.f32.mrb[178].mxu1 }
 0x31f   : > { %v3798_v20 = vpop.f32.mrb[179].mxu0  ;;  %v3886_v14 = vpop.f32.mrb[179].mxu1 }
 0x320   : > { %v3019_v39 = vadd.f32 %v3796_v31, %v4985_v46  ;;  %v3799_v41 = vadd.f32 %v3798_v20, %v3797_v34  ;;  %v3887_v42 = vadd.f32 %v3886_v14, %v3885_v38 }
 0x322   : > { %v3148_v23 = vadd.f32 %v3884_v36, %v3019_v39  ;;  %v3022_v43 = vadd.f32 %v3799_v41, %v4988_v49 }
 0x324   : > { %3194 = vst [vmem:[%s5012_s11 + $0x80] sm:$0xff] %v3148_v23  ;;  %v3151_v44 = vadd.f32 %v3887_v42, %v3022_v43  ;;  %v3800_v32 = vpop.f32.mrb[180].mxu0  ;;  %v3888_v48 = vpop.f32.mrb[180].mxu1 }
 0x325   : > { %v3801_v47 = vpop.f32.mrb[181].mxu0  ;;  %v3889_v54 = vpop.f32.mrb[181].mxu1 }
 0x326   : > { %3195 = vst [vmem:[%s5012_s11 + $0x88] sm:$0xff] %v3151_v44  ;;  %v3802_v51 = vadd.f32 %v3801_v47, %v3800_v32  ;;  %v3803_v35 = vpop.f32.mrb[182].mxu0  ;;  %v3890_v55 = vadd.f32 %v3889_v54, %v3888_v48  ;;  %v3891_v16 = vpop.f32.mrb[182].mxu1 }
 0x327   : > { %v3804_v46 = vpop.f32.mrb[183].mxu0  ;;  %v3892_v58 = vpop.f32.mrb[183].mxu1 }
 0x328   : > { %v3027_v6 = vadd.f32 %v3802_v51, %v4991_v2  ;;  %v3805_v13 = vadd.f32 %v3804_v46, %v3803_v35  ;;  %v3893_v59 = vadd.f32 %v3892_v58, %v3891_v16 }
 0x32a   : > { %v3156_v49 = vadd.f32 %v3890_v55, %v3027_v6  ;;  %v3030_v60 = vadd.f32 %v3805_v13, %v4994_v4 }
 0x32c   : > { %3196 = vst [vmem:[%s5012_s11 + $0x90] sm:$0xff] %v3156_v49  ;;  %v3159_v63 = vadd.f32 %v3893_v59, %v3030_v60  ;;  %v3806_v1 = vpop.f32.mrb[184].mxu0  ;;  %v3894_v30 = vpop.f32.mrb[184].mxu1 }
 0x32d   : > { %v3807_v52 = vpop.f32.mrb[185].mxu0  ;;  %v3895_v7 = vpop.f32.mrb[185].mxu1 }
 0x32e   : > { %3197 = vst [vmem:[%s5012_s11 + $0x98] sm:$0xff] %v3159_v63  ;;  %v3808_v3 = vadd.f32 %v3807_v52, %v3806_v1  ;;  %v3809_v0 = vpop.f32.mrb[186].mxu0  ;;  %v3896_v40 = vadd.f32 %v3895_v7, %v3894_v30  ;;  %v3897_v17 = vpop.f32.mrb[186].mxu1 }
 0x32f   : > { %v3810_v2 = vpop.f32.mrb[187].mxu0  ;;  %v3898_v9 = vpop.f32.mrb[187].mxu1 }
 0x330   : > { %v3035_v45 = vadd.f32 %v3808_v3, %v4997_v19  ;;  %v3811_v33 = vadd.f32 %v3810_v2, %v3809_v0  ;;  %v3899_v4 = vadd.f32 %v3898_v9, %v3897_v17 }
 0x332   : > { %v3164_v22 = vadd.f32 %v3896_v40, %v3035_v45  ;;  %v3038_v24 = vadd.f32 %v3811_v33, %v5000_v25 }
 0x334   : > { %3198 = vst [vmem:[%s5012_s11 + $0xa0] sm:$0xff] %v3164_v22  ;;  %v3167_v10 = vadd.f32 %v3899_v4, %v3038_v24  ;;  %v3812_v11 = vpop.f32.mrb[188].mxu0  ;;  %v3900_v12 = vpop.f32.mrb[188].mxu1 }
 0x335   : > { %v3813_v28 = vpop.f32.mrb[189].mxu0  ;;  %v3901_v5 = vpop.f32.mrb[189].mxu1 }
 0x336   : > { %3199 = vst [vmem:[%s5012_s11 + $0xa8] sm:$0xff] %v3167_v10  ;;  %v3814_v61 = vadd.f32 %v3813_v28, %v3812_v11  ;;  %v3815_v15 = vpop.f32.mrb[190].mxu0  ;;  %v3902_v19 = vadd.f32 %v3901_v5, %v3900_v12  ;;  %v3903_v37 = vpop.f32.mrb[190].mxu1 }
 0x337   : > { %v3816_v56 = vpop.f32.mrb[191].mxu0  ;;  %v3904_v8 = vpop.f32.mrb[191].mxu1 }
 0x338   : > { %v3043_v25 = vadd.f32 %v3814_v61, %v5003_v50  ;;  %v3817_v62 = vadd.f32 %v3816_v56, %v3815_v15  ;;  %v3905_v57 = vadd.f32 %v3904_v8, %v3903_v37 }
 0x33a   : > { %v3172_v18 = vadd.f32 %v3902_v19, %v3043_v25  ;;  %v3046_v21 = vadd.f32 %v3817_v62, %v5006_v53 }
 0x33c   : > { %3200 = vst [vmem:[%s5012_s11 + $0xb0] sm:$0xff] %v3172_v18  ;;  %v3175_v26 = vadd.f32 %v3905_v57, %v3046_v21 }
 0x33e   : > { %3201 = vst [vmem:[%s5012_s11 + $0xb8] sm:$0xff] %v3175_v26 }
 0x33f   : > { %4221 = shalt.err (!%p4218_p4)
}
 0x340   : > { %s4222_s23 = scalar_lea.hbm %s5063_s8, 3072  ;;  %s4226_s24 = scalar_lea.hbm %s5116_s5, 6144 }
 0x341   : > { %p4223_p9 = scmp.ne.s32.totalorder %s5063_s8, %s4222_s23  ;;  %p4227_p8 = scmp.lt.u32.totalorder %s5063_s8, %s5116_s5 }
 0x342   : > { %p4228_p13 = scmp.lt.u32.totalorder %s4226_s24, %s4222_s23  ;;  %p4230_p10 = scmp.lt.u32.totalorder %s4222_s23, %s5063_s8 }
 0x343   : > { %p4224_p0 = pnand %p4223_p9, %p4472_p5 }
 0x344   : > { %p4229_p6 = por %p4228_p13, %p4227_p8 }
 0x345   : > { %p4225_p11 = pneg %p4224_p0 }
 0x346   : > { %p4231_p3 = por %p4230_p10, %p4229_p6 }
 0x348   : > { %p4232_p7 = pnand %p4231_p3, %p4225_p11 }
 0x34a   : > { %4235 = shalt.err (!%p4232_p7)
}
 0x34b   : > { %s4295_s12 = smov 128   ;;  %s4296_s14 = smov 8  }
 0x34c   : > { %3922 = dma.vmem_to_hbm [thread:$0]  (%p4472_p5), %s5065_s6, 3072, %s5063_s8, %s3203_s22, %s4295_s12, %s4295_s12, %s4296_s14  }
 0x34d PF: > { %s3231_s29 = sand.u32 1, %s4270_s18   ;;  %p5134_p12 = scmp.ne.s32.totalorder %s5121_s25, 0 }
 0x34e   : > { %p5135_p2 = scmp.ge.s32.totalorder %s4282_s21, 2  ;;  %s3232_s10 = scalar_lea.sflag [#allocation4], %s3231_s29 }
 0x350   : > { %p3939_p1 = pnand %p5135_p2, %p5134_p12 }
 0x352   : > { %4265 = dma.done.wait (!%p3939_p1), %s3232_s10, 3072  }
 0x353   : > { %4267 = vsyncadd (!%p3939_p1), %s3232_s10, 4294964224  ;;  %p20_p4 = scmp.ge.s32.totalorder %s4458_s28, 4   ;;  %s5136_s18 = smov %s4274_s19 }
 0x354   : > { %s5137_s19 = smov %s4278_s20  ;;  %s5138_s20 = smov %s4468_s27 }
 0x355   : > { %s5139_s21 = smov %s4458_s28  ;;  %22 = sbr.rel (!%p20_p4) target bundleno = 7 (0x7), region = 97 }
 0x35c   :  { %3237 = vsyncpa [#allocation3], 1 }
 0x35d   :  { %3239 = vsyncpa [#allocation3 + $0x1], 1 }
 0x35e   :  { %3240 = vsyncpa [#allocation6], 1 }
 0x35f   :  { %3241 = vsyncpa [#allocation9], 1 }
 0x360   :  { %3242 = vsyncpa [#allocation4], 1 }
 0x361   :  { %3244 = vsyncpa [#allocation4 + $0x1], 1 }

</bundles_post_ra>
